<compile_context>
chip_gen: v7x
topology: tpu7x:2x2x1
jax: 0.10.0
libtpu: 0.0.40
codegen_flags: <defaults>
</compile_context>

<pallas_src>
import math
from functools import lru_cache

import jax
import jax.numpy as jnp
import numpy as np
from jax.experimental import pallas as pl
from jax.experimental.pallas import tpu as pltpu


# Raised scoped-VMEM limit: larger than every generation's default (16/32/32 MiB)
# yet safely below v7x's 64 MiB physical VMEM (v5e/v6e have 128 MiB physical).
_VMEM_LIMIT_BYTES = 48 * 1024 * 1024


def _fourier_block_kernel(x_ref, wr_ref, wi_ref, cos_ref, nsin_ref,
                          icos_ref, isin_ref, o_ref):
    """One batch block: truncated rfft -> complex channel mix -> truncated irfft -> +residual.

    x_ref:               (Bb*C, L)        I/O dtype, batch-major rows
    wr_ref / wi_ref:     (C_in, C_out, Mp) f32   weights, zero-padded on the mode axis
    cos_ref / nsin_ref:  (L, Mp)          bf16   forward bases: x@cos = Re, x@(-sin) = Im
    icos_ref / isin_ref: (Mp, L)          bf16   inverse bases, c_k/L Hermitian weights folded in
    o_ref:               (Bb*C, L)        I/O dtype
    """
    c_in, c_out, mp = wr_ref.shape
    rows = x_ref.shape[0]
    bb = rows // c_in

    # (1) Truncated rfft (lowest M modes, lane-padded to Mp): two bf16 MXU
    #     matmuls with f32 accumulation.  x is re-read from VMEM later for the
    #     residual instead of holding an f32 copy live across the whole body.
    xb = x_ref[...].astype(jnp.bfloat16)
    xr = jnp.dot(xb, cos_ref[...], preferred_element_type=jnp.float32)    # (rows, Mp) Re
    xi = jnp.dot(xb, nsin_ref[...], preferred_element_type=jnp.float32)   # (rows, Mp) Im

    # (2) Per-mode complex channel mixing Y[b,o,k] = sum_i X[b,i,k] * W[i,o,k],
    #     in f32 on the VPU (v5e has no bf16 VALU).  We accumulate -Im(Y)
    #     directly so the inverse transform is two plain matmuls.
    xr3 = xr.reshape(bb, c_in, mp)
    xi3 = xi.reshape(bb, c_in, mp)
    yr = jnp.zeros((bb, c_out, mp), jnp.float32)
    nyi = jnp.zeros((bb, c_out, mp), jnp.float32)
    if c_in <= 8:
        # Small channel count: static unroll, vectorized over the batch block.
        for i in range(c_in):
            xr_i = xr3[:, i:i + 1, :]                        # (Bb, 1, Mp)
            xi_i = xi3[:, i:i + 1, :]
            wr_i = wr_ref[i][None]                           # (1, C_out, Mp)
            wi_i = wi_ref[i][None]
            yr = yr + xr_i * wr_i - xi_i * wi_i
            nyi = nyi - xr_i * wi_i - xi_i * wr_i
    else:
        # Larger channel counts: bound live ranges with a real loop.
        # TODO(synk): reformulate as per-mode-block MXU matmuls for C >> 8.
        def body(i, carry):
            yr_c, nyi_c = carry
            xr_i = jax.lax.dynamic_slice_in_dim(xr3, i, 1, axis=1)
            xi_i = jax.lax.dynamic_slice_in_dim(xi3, i, 1, axis=1)
            wr_i = wr_ref[i][None]
            wi_i = wi_ref[i][None]
            return (yr_c + xr_i * wr_i - xi_i * wi_i,
                    nyi_c - xr_i * wi_i - xi_i * wr_i)
        yr, nyi = jax.lax.fori_loop(0, c_in, body, (yr, nyi))

    # (3) Truncated irfft: two bf16 MXU matmuls, f32 accumulation.  No concat:
    #     enh = Yr @ icos + (-Yi) @ isin.
    yrb = yr.reshape(bb * c_out, mp).astype(jnp.bfloat16)
    nyib = nyi.reshape(bb * c_out, mp).astype(jnp.bfloat16)
    enh = (jnp.dot(yrb, icos_ref[...], preferred_element_type=jnp.float32)
           + jnp.dot(nyib, isin_ref[...], preferred_element_type=jnp.float32))

    # (4) Residual add in f32 (exact), stored back in the I/O dtype.
    o_ref[...] = (x_ref[...].astype(jnp.float32) + enh).astype(o_ref.dtype)


@lru_cache(maxsize=None)
def _dft_bases_np(L, M, Mp):
    """Forward / inverse truncated-DFT bases (NumPy, cached host-side)."""
    # Reduce n*k mod L in integer arithmetic before scaling so the angle stays
    # accurate even when L*M is large, then evaluate cos/sin in float64.
    n = np.arange(L, dtype=np.int64)
    k = np.arange(M, dtype=np.int64)
    ang = (2.0 * np.pi / L) * ((n[:, None] * k[None, :]) % L).astype(np.float64)
    cos, sin = np.cos(ang), np.sin(ang)
    # c_k = 2/L for k>0, 1/L for k=0; valid because M <= L//2 (Nyquist excluded).
    ck = np.where(k == 0, 1.0, 2.0) / L
    cosb = np.zeros((L, Mp), np.float32)
    nsinb = np.zeros((L, Mp), np.float32)
    icosb = np.zeros((Mp, L), np.float32)
    isinb = np.zeros((Mp, L), np.float32)
    cosb[:, :M] = cos
    nsinb[:, :M] = -sin
    icosb[:M, :] = ck[:, None] * cos.T
    isinb[:M, :] = ck[:, None] * sin.T
    return cosb, nsinb, icosb, isinb


def _choose_block_batch(B, C, L, Mp, io_itemsize):
    """Pick the per-grid-step batch count Bb.

    rows = Bb*C must be a multiple of 8 unless the block covers the full row
    extent; prefer (a) fitting the VMEM budget, (b) no batch padding, and
    (c) >= 2 grid steps (pipelining overlap / v7x two-TensorCore sharding).
    """
    # Per-row VMEM estimate: double-buffered in+out blocks, the bf16 cast of x,
    # the two f32 irfft partial results, plus per-mode f32 temporaries.
    row_bytes = L * (4 * io_itemsize + 2 + 8) + 40 * Mp
    const_bytes = 4 * L * Mp * 2 + 2 * C * C * Mp * 4        # resident bases + weights
    budget = _VMEM_LIMIT_BYTES - const_bytes - (8 << 20)     # headroom for scratch
    rows_max = max(8, budget // row_bytes)
    bb_budget = max(1, int(rows_max) // C)

    bb_hi = min(B, bb_budget)
    if B > 1:
        bb_hi = min(bb_hi, -(-B // 2))                       # prefer nb >= 2
    bb_hi = max(1, bb_hi)

    # First choice: largest divisor of B (no padding) with sublane-aligned rows
    # (or covering the whole row extent, which is always legal).
    for d in range(bb_hi, 0, -1):
        if B % d == 0 and ((d * C) % 8 == 0 or d == B):
            return d
    # Otherwise: the sublane-aligned block size minimizing batch padding; never
    # degenerate to one huge full-array block for large inputs.
    step = 8 // math.gcd(C, 8)
    best = None
    for d in range(step, bb_hi + 1, step):
        key = ((-B) % d, -d)
        if best is None or key < best[0]:
            best = (key, d)
    if best is not None:
        return best[1]
    return step if step < B else B


def fourier_block(feature, weights1_real, weights1_img, *, block_batch=None):
    """feature: (B, C, H, W); weights: (C_in, C_out, modes, 1) as in the PyTorch module."""
    B, C, H, W = feature.shape
    L = H * W
    c_in, c_out = weights1_real.shape[0], weights1_real.shape[1]
    assert c_in == C and c_out == C, "in/out channels must equal C for the residual add"
    # get_frequency_modes clamps modes to L//2 -> Nyquist is never selected,
    # which makes the c_k = 2 Hermitian weighting in the inverse basis exact.
    M = min(weights1_real.shape[2], L // 2)
    if M <= 0:
        return feature                                       # no modes selected: enh == 0

    # Pad the mode axis to a 128-lane multiple (padded modes contribute exactly
    # zero) so all matmuls / VPU work are lane-dense.
    Mp = ((M + 127) // 128) * 128

    # Kernel I/O stays in the feature dtype (no wrapper up/down-cast passes).
    if feature.dtype in (jnp.dtype(jnp.float32), jnp.dtype(jnp.bfloat16)):
        io_dtype = feature.dtype
    else:
        io_dtype = jnp.dtype(jnp.float32)

    wr = jnp.pad(weights1_real[:, :, :M, 0].astype(jnp.float32),
                 ((0, 0), (0, 0), (0, Mp - M)))              # (C, C, Mp) f32
    wi = jnp.pad(weights1_img[:, :, :M, 0].astype(jnp.float32),
                 ((0, 0), (0, 0), (0, Mp - M)))
    cos_np, nsin_np, icos_np, isin_np = _dft_bases_np(L, M, Mp)
    cosb = jnp.asarray(cos_np, dtype=jnp.bfloat16)
    nsinb = jnp.asarray(nsin_np, dtype=jnp.bfloat16)
    icosb = jnp.asarray(icos_np, dtype=jnp.bfloat16)
    isinb = jnp.asarray(isin_np, dtype=jnp.bfloat16)

    if block_batch is not None:
        Bb = max(1, min(int(block_batch), B))
    else:
        Bb = _choose_block_batch(B, C, L, Mp, jnp.dtype(io_dtype).itemsize)
    nb = -(-B // Bb)
    B_pad = nb * Bb

    x = feature.reshape(B, C, L)
    if x.dtype != io_dtype:
        x = x.astype(io_dtype)
    if B_pad != B:
        # Rare (only when no pad-free aligned Bb exists): costs one extra pass.
        x = jnp.pad(x, ((0, B_pad - B), (0, 0), (0, 0)))
    x2d = x.reshape(B_pad * C, L)                            # layout-preserving (free)

    rows_blk = Bb * C

    def _call(single_buffer_consts):
        const_kw = {"pipeline_mode": pl.Buffered(1)} if single_buffer_consts else {}
        return pl.pallas_call(
            _fourier_block_kernel,
            out_shape=jax.ShapeDtypeStruct((B_pad * C, L), io_dtype),
            grid=(nb,),
            in_specs=[
                pl.BlockSpec((rows_blk, L), lambda b: (b, 0)),
                # Constant operands: constant index maps -> VMEM-resident across
                # all grid steps (and single-buffered when supported).
                pl.BlockSpec((C, C, Mp), lambda b: (0, 0, 0), **const_kw),
                pl.BlockSpec((C, C, Mp), lambda b: (0, 0, 0), **const_kw),
                pl.BlockSpec((L, Mp), lambda b: (0, 0), **const_kw),
                pl.BlockSpec((L, Mp), lambda b: (0, 0), **const_kw),
                pl.BlockSpec((Mp, L), lambda b: (0, 0), **const_kw),
                pl.BlockSpec((Mp, L), lambda b: (0, 0), **const_kw),
            ],
            out_specs=pl.BlockSpec((rows_blk, L), lambda b: (b, 0)),
            compiler_params=pltpu.CompilerParams(
                dimension_semantics=("parallel",),
                vmem_limit_bytes=_VMEM_LIMIT_BYTES),
        )(x2d, wr, wi, cosb, nsinb, icosb, isinb)

    try:
        out2d = _call(True)        # single-buffer the constant operands
    except Exception:              # fallback if Buffered(1) is unsupported
        out2d = _call(False)

    out = out2d.reshape(B_pad, C, L)[:B].reshape(B, C, H, W)
    return out.astype(feature.dtype)


if __name__ == "__main__":
    # Small shapes consistent with the module: in_channels = out_channels = C.
    B, C, H, W = 2, 4, 16, 16
    modes_param = 16
    L = H * W
    M = min(modes_param, L // 2)                 # get_frequency_modes clamps modes

    key = jax.random.PRNGKey(0)
    kx, kr, ki = jax.random.split(key, 3)
    feature = jax.random.normal(kx, (B, C, H, W), dtype=jnp.float32)
    scale = 1.0 / (C * C)
    weights1_real = scale * jax.random.uniform(kr, (C, C, modes_param, 1), dtype=jnp.float32)
    weights1_img = scale * jax.random.uniform(ki, (C, C, modes_param, 1), dtype=jnp.float32)

    out = jax.block_until_ready(fourier_block(feature, weights1_real, weights1_img))

    # Pure-JAX reference mirroring the PyTorch forward (rfft / channel mix /
    # irfft, mode_select_method='constant' -> lowest M modes).
    x_flat = feature.reshape(B, C, L)
    x_ft = jnp.fft.rfft(x_flat, axis=-1)                               # (B, C, L//2+1)
    w_c = (weights1_real[..., 0] + 1j * weights1_img[..., 0]).astype(jnp.complex64)
    out_low = jnp.einsum("bik,iok->bok", x_ft[:, :, :M], w_c[:, :, :M])
    out_ft = jnp.zeros((B, C, L // 2 + 1), jnp.complex64).at[:, :, :M].set(out_low)
    ref = feature + jnp.fft.irfft(out_ft, n=L, axis=-1).reshape(B, C, H, W)

    err = float(jnp.max(jnp.abs(out - ref)))
    assert out.shape == (B, C, H, W)
    assert err < 1e-2, f"max abs error too large: {err}"
    print("KERNEL_OK")
</pallas_src>

<mosaic_0001>
module attributes {stable_mosaic.version = 11 : i64} {
  func.func @_fourier_block_kernel(%arg0: i32, %arg1: memref<8x256xf32, #tpu.memory_space<vmem>>, %arg2: memref<4x4x128xf32, #tpu.memory_space<vmem>>, %arg3: memref<4x4x128xf32, #tpu.memory_space<vmem>>, %arg4: memref<256x128xbf16, #tpu.memory_space<vmem>>, %arg5: memref<256x128xbf16, #tpu.memory_space<vmem>>, %arg6: memref<128x256xbf16, #tpu.memory_space<vmem>>, %arg7: memref<128x256xbf16, #tpu.memory_space<vmem>>, %arg8: memref<8x256xf32, #tpu.memory_space<vmem>>) attributes {dimension_semantics = [#tpu.dimension_semantics<parallel>], iteration_bounds = array<i64: 1>, scalar_prefetch = 0 : i64, scratch_operands = 0 : i64, tpu.core_type = #tpu.core_type<tc>, window_params = [{transform_indices = @transform_0, window_bounds = array<i64: 8, 256>}, {pipeline_mode = #tpu.pipeline_mode<synchronous>, transform_indices = @transform_1, window_bounds = array<i64: 4, 4, 128>}, {pipeline_mode = #tpu.pipeline_mode<synchronous>, transform_indices = @transform_2, window_bounds = array<i64: 4, 4, 128>}, {pipeline_mode = #tpu.pipeline_mode<synchronous>, transform_indices = @transform_3, window_bounds = array<i64: 256, 128>}, {pipeline_mode = #tpu.pipeline_mode<synchronous>, transform_indices = @transform_4, window_bounds = array<i64: 256, 128>}, {pipeline_mode = #tpu.pipeline_mode<synchronous>, transform_indices = @transform_5, window_bounds = array<i64: 128, 256>}, {pipeline_mode = #tpu.pipeline_mode<synchronous>, transform_indices = @transform_6, window_bounds = array<i64: 128, 256>}, {transform_indices = @transform_7, window_bounds = array<i64: 8, 256>}]} {
    %c0 = arith.constant 0 : index
    %c0_0 = arith.constant 0 : index
    %0 = vector.load %arg1[%c0, %c0_0] : memref<8x256xf32, #tpu.memory_space<vmem>>, vector<8x256xf32>
    %1 = arith.truncf %0 : vector<8x256xf32> to vector<8x256xbf16>
    %c0_1 = arith.constant 0 : index
    %c0_2 = arith.constant 0 : index
    %2 = vector.load %arg4[%c0_1, %c0_2] : memref<256x128xbf16, #tpu.memory_space<vmem>>, vector<256x128xbf16>
    %cst = arith.constant dense<0.000000e+00> : vector<8x128xf32>
    %3 = tpu.matmul %1, %2, %cst {dimension_numbers = #tpu.dot_dimension_numbers<[1], [0], [0], [1], [0, 0, 1, 1], [], []>} : vector<8x256xbf16>, vector<256x128xbf16>, vector<8x128xf32> -> vector<8x128xf32>
    %c0_3 = arith.constant 0 : index
    %c0_4 = arith.constant 0 : index
    %4 = vector.load %arg5[%c0_3, %c0_4] : memref<256x128xbf16, #tpu.memory_space<vmem>>, vector<256x128xbf16>
    %cst_5 = arith.constant dense<0.000000e+00> : vector<8x128xf32>
    %5 = tpu.matmul %1, %4, %cst_5 {dimension_numbers = #tpu.dot_dimension_numbers<[1], [0], [0], [1], [0, 0, 1, 1], [], []>} : vector<8x256xbf16>, vector<256x128xbf16>, vector<8x128xf32> -> vector<8x128xf32>
    %6 = vector.shape_cast %3 : vector<8x128xf32> to vector<2x4x128xf32>
    %7 = vector.shape_cast %5 : vector<8x128xf32> to vector<2x4x128xf32>
    %cst_6 = arith.constant 0.000000e+00 : f32
    %8 = vector.broadcast %cst_6 : f32 to vector<2x4x128xf32>
    %cst_7 = arith.constant 0.000000e+00 : f32
    %9 = vector.broadcast %cst_7 : f32 to vector<2x4x128xf32>
    %10 = vector.extract_strided_slice %6 {offsets = [0, 0, 0], sizes = [2, 1, 128], strides = [1, 1, 1]} : vector<2x4x128xf32> to vector<2x1x128xf32>
    %11 = vector.extract_strided_slice %7 {offsets = [0, 0, 0], sizes = [2, 1, 128], strides = [1, 1, 1]} : vector<2x4x128xf32> to vector<2x1x128xf32>
    %c0_8 = arith.constant 0 : index
    %c0_9 = arith.constant 0 : index
    %c0_10 = arith.constant 0 : index
    %12 = vector.load %arg2[%c0_8, %c0_9, %c0_10] : memref<4x4x128xf32, #tpu.memory_space<vmem>>, vector<1x4x128xf32>
    %13 = vector.shape_cast %12 : vector<1x4x128xf32> to vector<4x128xf32>
    %14 = vector.shape_cast %13 : vector<4x128xf32> to vector<1x4x128xf32>
    %c0_11 = arith.constant 0 : index
    %c0_12 = arith.constant 0 : index
    %c0_13 = arith.constant 0 : index
    %15 = vector.load %arg3[%c0_11, %c0_12, %c0_13] : memref<4x4x128xf32, #tpu.memory_space<vmem>>, vector<1x4x128xf32>
    %16 = vector.shape_cast %15 : vector<1x4x128xf32> to vector<4x128xf32>
    %17 = vector.shape_cast %16 : vector<4x128xf32> to vector<1x4x128xf32>
    %18 = vector.broadcast %10 : vector<2x1x128xf32> to vector<2x4x128xf32>
    %19 = vector.broadcast %14 : vector<1x4x128xf32> to vector<2x4x128xf32>
    %20 = arith.mulf %18, %19 : vector<2x4x128xf32>
    %21 = arith.addf %8, %20 : vector<2x4x128xf32>
    %22 = vector.broadcast %11 : vector<2x1x128xf32> to vector<2x4x128xf32>
    %23 = vector.broadcast %17 : vector<1x4x128xf32> to vector<2x4x128xf32>
    %24 = arith.mulf %22, %23 : vector<2x4x128xf32>
    %25 = arith.subf %21, %24 : vector<2x4x128xf32>
    %26 = vector.broadcast %10 : vector<2x1x128xf32> to vector<2x4x128xf32>
    %27 = vector.broadcast %17 : vector<1x4x128xf32> to vector<2x4x128xf32>
    %28 = arith.mulf %26, %27 : vector<2x4x128xf32>
    %29 = arith.subf %9, %28 : vector<2x4x128xf32>
    %30 = vector.broadcast %11 : vector<2x1x128xf32> to vector<2x4x128xf32>
    %31 = vector.broadcast %14 : vector<1x4x128xf32> to vector<2x4x128xf32>
    %32 = arith.mulf %30, %31 : vector<2x4x128xf32>
    %33 = arith.subf %29, %32 : vector<2x4x128xf32>
    %34 = vector.extract_strided_slice %6 {offsets = [0, 1, 0], sizes = [2, 1, 128], strides = [1, 1, 1]} : vector<2x4x128xf32> to vector<2x1x128xf32>
    %35 = vector.extract_strided_slice %7 {offsets = [0, 1, 0], sizes = [2, 1, 128], strides = [1, 1, 1]} : vector<2x4x128xf32> to vector<2x1x128xf32>
    %c1 = arith.constant 1 : index
    %c0_14 = arith.constant 0 : index
    %c0_15 = arith.constant 0 : index
    %36 = vector.load %arg2[%c1, %c0_14, %c0_15] : memref<4x4x128xf32, #tpu.memory_space<vmem>>, vector<1x4x128xf32>
    %37 = vector.shape_cast %36 : vector<1x4x128xf32> to vector<4x128xf32>
    %38 = vector.shape_cast %37 : vector<4x128xf32> to vector<1x4x128xf32>
    %c1_16 = arith.constant 1 : index
    %c0_17 = arith.constant 0 : index
    %c0_18 = arith.constant 0 : index
    %39 = vector.load %arg3[%c1_16, %c0_17, %c0_18] : memref<4x4x128xf32, #tpu.memory_space<vmem>>, vector<1x4x128xf32>
    %40 = vector.shape_cast %39 : vector<1x4x128xf32> to vector<4x128xf32>
    %41 = vector.shape_cast %40 : vector<4x128xf32> to vector<1x4x128xf32>
    %42 = vector.broadcast %34 : vector<2x1x128xf32> to vector<2x4x128xf32>
    %43 = vector.broadcast %38 : vector<1x4x128xf32> to vector<2x4x128xf32>
    %44 = arith.mulf %42, %43 : vector<2x4x128xf32>
    %45 = arith.addf %25, %44 : vector<2x4x128xf32>
    %46 = vector.broadcast %35 : vector<2x1x128xf32> to vector<2x4x128xf32>
    %47 = vector.broadcast %41 : vector<1x4x128xf32> to vector<2x4x128xf32>
    %48 = arith.mulf %46, %47 : vector<2x4x128xf32>
    %49 = arith.subf %45, %48 : vector<2x4x128xf32>
    %50 = vector.broadcast %34 : vector<2x1x128xf32> to vector<2x4x128xf32>
    %51 = vector.broadcast %41 : vector<1x4x128xf32> to vector<2x4x128xf32>
    %52 = arith.mulf %50, %51 : vector<2x4x128xf32>
    %53 = arith.subf %33, %52 : vector<2x4x128xf32>
    %54 = vector.broadcast %35 : vector<2x1x128xf32> to vector<2x4x128xf32>
    %55 = vector.broadcast %38 : vector<1x4x128xf32> to vector<2x4x128xf32>
    %56 = arith.mulf %54, %55 : vector<2x4x128xf32>
    %57 = arith.subf %53, %56 : vector<2x4x128xf32>
    %58 = vector.extract_strided_slice %6 {offsets = [0, 2, 0], sizes = [2, 1, 128], strides = [1, 1, 1]} : vector<2x4x128xf32> to vector<2x1x128xf32>
    %59 = vector.extract_strided_slice %7 {offsets = [0, 2, 0], sizes = [2, 1, 128], strides = [1, 1, 1]} : vector<2x4x128xf32> to vector<2x1x128xf32>
    %c2 = arith.constant 2 : index
    %c0_19 = arith.constant 0 : index
    %c0_20 = arith.constant 0 : index
    %60 = vector.load %arg2[%c2, %c0_19, %c0_20] : memref<4x4x128xf32, #tpu.memory_space<vmem>>, vector<1x4x128xf32>
    %61 = vector.shape_cast %60 : vector<1x4x128xf32> to vector<4x128xf32>
    %62 = vector.shape_cast %61 : vector<4x128xf32> to vector<1x4x128xf32>
    %c2_21 = arith.constant 2 : index
    %c0_22 = arith.constant 0 : index
    %c0_23 = arith.constant 0 : index
    %63 = vector.load %arg3[%c2_21, %c0_22, %c0_23] : memref<4x4x128xf32, #tpu.memory_space<vmem>>, vector<1x4x128xf32>
    %64 = vector.shape_cast %63 : vector<1x4x128xf32> to vector<4x128xf32>
    %65 = vector.shape_cast %64 : vector<4x128xf32> to vector<1x4x128xf32>
    %66 = vector.broadcast %58 : vector<2x1x128xf32> to vector<2x4x128xf32>
    %67 = vector.broadcast %62 : vector<1x4x128xf32> to vector<2x4x128xf32>
    %68 = arith.mulf %66, %67 : vector<2x4x128xf32>
    %69 = arith.addf %49, %68 : vector<2x4x128xf32>
    %70 = vector.broadcast %59 : vector<2x1x128xf32> to vector<2x4x128xf32>
    %71 = vector.broadcast %65 : vector<1x4x128xf32> to vector<2x4x128xf32>
    %72 = arith.mulf %70, %71 : vector<2x4x128xf32>
    %73 = arith.subf %69, %72 : vector<2x4x128xf32>
    %74 = vector.broadcast %58 : vector<2x1x128xf32> to vector<2x4x128xf32>
    %75 = vector.broadcast %65 : vector<1x4x128xf32> to vector<2x4x128xf32>
    %76 = arith.mulf %74, %75 : vector<2x4x128xf32>
    %77 = arith.subf %57, %76 : vector<2x4x128xf32>
    %78 = vector.broadcast %59 : vector<2x1x128xf32> to vector<2x4x128xf32>
    %79 = vector.broadcast %62 : vector<1x4x128xf32> to vector<2x4x128xf32>
    %80 = arith.mulf %78, %79 : vector<2x4x128xf32>
    %81 = arith.subf %77, %80 : vector<2x4x128xf32>
    %82 = vector.extract_strided_slice %6 {offsets = [0, 3, 0], sizes = [2, 1, 128], strides = [1, 1, 1]} : vector<2x4x128xf32> to vector<2x1x128xf32>
    %83 = vector.extract_strided_slice %7 {offsets = [0, 3, 0], sizes = [2, 1, 128], strides = [1, 1, 1]} : vector<2x4x128xf32> to vector<2x1x128xf32>
    %c3 = arith.constant 3 : index
    %c0_24 = arith.constant 0 : index
    %c0_25 = arith.constant 0 : index
    %84 = vector.load %arg2[%c3, %c0_24, %c0_25] : memref<4x4x128xf32, #tpu.memory_space<vmem>>, vector<1x4x128xf32>
    %85 = vector.shape_cast %84 : vector<1x4x128xf32> to vector<4x128xf32>
    %86 = vector.shape_cast %85 : vector<4x128xf32> to vector<1x4x128xf32>
    %c3_26 = arith.constant 3 : index
    %c0_27 = arith.constant 0 : index
    %c0_28 = arith.constant 0 : index
    %87 = vector.load %arg3[%c3_26, %c0_27, %c0_28] : memref<4x4x128xf32, #tpu.memory_space<vmem>>, vector<1x4x128xf32>
    %88 = vector.shape_cast %87 : vector<1x4x128xf32> to vector<4x128xf32>
    %89 = vector.shape_cast %88 : vector<4x128xf32> to vector<1x4x128xf32>
    %90 = vector.broadcast %82 : vector<2x1x128xf32> to vector<2x4x128xf32>
    %91 = vector.broadcast %86 : vector<1x4x128xf32> to vector<2x4x128xf32>
    %92 = arith.mulf %90, %91 : vector<2x4x128xf32>
    %93 = arith.addf %73, %92 : vector<2x4x128xf32>
    %94 = vector.broadcast %83 : vector<2x1x128xf32> to vector<2x4x128xf32>
    %95 = vector.broadcast %89 : vector<1x4x128xf32> to vector<2x4x128xf32>
    %96 = arith.mulf %94, %95 : vector<2x4x128xf32>
    %97 = arith.subf %93, %96 : vector<2x4x128xf32>
    %98 = vector.broadcast %82 : vector<2x1x128xf32> to vector<2x4x128xf32>
    %99 = vector.broadcast %89 : vector<1x4x128xf32> to vector<2x4x128xf32>
    %100 = arith.mulf %98, %99 : vector<2x4x128xf32>
    %101 = arith.subf %81, %100 : vector<2x4x128xf32>
    %102 = vector.broadcast %83 : vector<2x1x128xf32> to vector<2x4x128xf32>
    %103 = vector.broadcast %86 : vector<1x4x128xf32> to vector<2x4x128xf32>
    %104 = arith.mulf %102, %103 : vector<2x4x128xf32>
    %105 = arith.subf %101, %104 : vector<2x4x128xf32>
    %106 = vector.shape_cast %97 : vector<2x4x128xf32> to vector<8x128xf32>
    %107 = arith.truncf %106 : vector<8x128xf32> to vector<8x128xbf16>
    %108 = vector.shape_cast %105 : vector<2x4x128xf32> to vector<8x128xf32>
    %109 = arith.truncf %108 : vector<8x128xf32> to vector<8x128xbf16>
    %c0_29 = arith.constant 0 : index
    %c0_30 = arith.constant 0 : index
    %110 = vector.load %arg6[%c0_29, %c0_30] : memref<128x256xbf16, #tpu.memory_space<vmem>>, vector<128x256xbf16>
    %cst_31 = arith.constant dense<0.000000e+00> : vector<8x256xf32>
    %111 = tpu.matmul %107, %110, %cst_31 {dimension_numbers = #tpu.dot_dimension_numbers<[1], [0], [0], [1], [0, 0, 1, 1], [], []>} : vector<8x128xbf16>, vector<128x256xbf16>, vector<8x256xf32> -> vector<8x256xf32>
    %c0_32 = arith.constant 0 : index
    %c0_33 = arith.constant 0 : index
    %112 = vector.load %arg7[%c0_32, %c0_33] : memref<128x256xbf16, #tpu.memory_space<vmem>>, vector<128x256xbf16>
    %cst_34 = arith.constant dense<0.000000e+00> : vector<8x256xf32>
    %113 = tpu.matmul %109, %112, %cst_34 {dimension_numbers = #tpu.dot_dimension_numbers<[1], [0], [0], [1], [0, 0, 1, 1], [], []>} : vector<8x128xbf16>, vector<128x256xbf16>, vector<8x256xf32> -> vector<8x256xf32>
    %114 = arith.addf %111, %113 : vector<8x256xf32>
    %c0_35 = arith.constant 0 : index
    %c0_36 = arith.constant 0 : index
    %115 = vector.load %arg1[%c0_35, %c0_36] : memref<8x256xf32, #tpu.memory_space<vmem>>, vector<8x256xf32>
    %116 = arith.addf %115, %114 : vector<8x256xf32>
    %c0_37 = arith.constant 0 : index
    %c0_38 = arith.constant 0 : index
    %117 = vector.load %arg8[%c0_37, %c0_38] : memref<8x256xf32, #tpu.memory_space<vmem>>, vector<8x256xf32>
    tpu.vector_store %arg8[%c0_37, %c0_38], %116 {strides = array<i32>} : memref<8x256xf32, #tpu.memory_space<vmem>>, vector<8x256xf32>,
    return
  }
  func.func @transform_0(%arg0: i32) -> (i32, i32) {
    %c0_i32 = arith.constant 0 : i32
    %c0_i32_0 = arith.constant 0 : i32
    return %arg0, %c0_i32 : i32, i32
  }
  func.func @transform_1(%arg0: i32) -> (i32, i32, i32) {
    %c0_i32 = arith.constant 0 : i32
    %c0_i32_0 = arith.constant 0 : i32
    %c0_i32_1 = arith.constant 0 : i32
    %c0_i32_2 = arith.constant 0 : i32
    return %c0_i32, %c0_i32_0, %c0_i32_1 : i32, i32, i32
  }
  func.func @transform_2(%arg0: i32) -> (i32, i32, i32) {
    %c0_i32 = arith.constant 0 : i32
    %c0_i32_0 = arith.constant 0 : i32
    %c0_i32_1 = arith.constant 0 : i32
    %c0_i32_2 = arith.constant 0 : i32
    return %c0_i32, %c0_i32_0, %c0_i32_1 : i32, i32, i32
  }
  func.func @transform_3(%arg0: i32) -> (i32, i32) {
    %c0_i32 = arith.constant 0 : i32
    %c0_i32_0 = arith.constant 0 : i32
    %c0_i32_1 = arith.constant 0 : i32
    return %c0_i32, %c0_i32_0 : i32, i32
  }
  func.func @transform_4(%arg0: i32) -> (i32, i32) {
    %c0_i32 = arith.constant 0 : i32
    %c0_i32_0 = arith.constant 0 : i32
    %c0_i32_1 = arith.constant 0 : i32
    return %c0_i32, %c0_i32_0 : i32, i32
  }
  func.func @transform_5(%arg0: i32) -> (i32, i32) {
    %c0_i32 = arith.constant 0 : i32
    %c0_i32_0 = arith.constant 0 : i32
    %c0_i32_1 = arith.constant 0 : i32
    return %c0_i32, %c0_i32_0 : i32, i32
  }
  func.func @transform_6(%arg0: i32) -> (i32, i32) {
    %c0_i32 = arith.constant 0 : i32
    %c0_i32_0 = arith.constant 0 : i32
    %c0_i32_1 = arith.constant 0 : i32
    return %c0_i32, %c0_i32_0 : i32, i32
  }
  func.func @transform_7(%arg0: i32) -> (i32, i32) {
    %c0_i32 = arith.constant 0 : i32
    %c0_i32_0 = arith.constant 0 : i32
    return %arg0, %c0_i32 : i32, i32
  }
}

module attributes {stable_mosaic.version = 11 : i64} {
  func.func @_fourier_block_kernel(%arg0: i32, %arg1: memref<8x256xf32, #tpu.memory_space<vmem>>, %arg2: memref<4x4x128xf32, #tpu.memory_space<vmem>>, %arg3: memref<4x4x128xf32, #tpu.memory_space<vmem>>, %arg4: memref<256x128xbf16, #tpu.memory_space<vmem>>, %arg5: memref<256x128xbf16, #tpu.memory_space<vmem>>, %arg6: memref<128x256xbf16, #tpu.memory_space<vmem>>, %arg7: memref<128x256xbf16, #tpu.memory_space<vmem>>, %arg8: memref<8x256xf32, #tpu.memory_space<vmem>>) attributes {dimension_semantics = [#tpu.dimension_semantics<parallel>], iteration_bounds = array<i64: 1>, scalar_prefetch = 0 : i64, scratch_operands = 0 : i64, tpu.core_type = #tpu.core_type<tc>, window_params = [{transform_indices = @transform_0, window_bounds = array<i64: 8, 256>}, {pipeline_mode = #tpu.pipeline_mode<synchronous>, transform_indices = @transform_1, window_bounds = array<i64: 4, 4, 128>}, {pipeline_mode = #tpu.pipeline_mode<synchronous>, transform_indices = @transform_2, window_bounds = array<i64: 4, 4, 128>}, {pipeline_mode = #tpu.pipeline_mode<synchronous>, transform_indices = @transform_3, window_bounds = array<i64: 256, 128>}, {pipeline_mode = #tpu.pipeline_mode<synchronous>, transform_indices = @transform_4, window_bounds = array<i64: 256, 128>}, {pipeline_mode = #tpu.pipeline_mode<synchronous>, transform_indices = @transform_5, window_bounds = array<i64: 128, 256>}, {pipeline_mode = #tpu.pipeline_mode<synchronous>, transform_indices = @transform_6, window_bounds = array<i64: 128, 256>}, {transform_indices = @transform_7, window_bounds = array<i64: 8, 256>}]} {
    %c0 = arith.constant 0 : index
    %c0_0 = arith.constant 0 : index
    %0 = vector.load %arg1[%c0, %c0_0] : memref<8x256xf32, #tpu.memory_space<vmem>>, vector<8x256xf32>
    %1 = arith.truncf %0 : vector<8x256xf32> to vector<8x256xbf16>
    %c0_1 = arith.constant 0 : index
    %c0_2 = arith.constant 0 : index
    %2 = vector.load %arg4[%c0_1, %c0_2] : memref<256x128xbf16, #tpu.memory_space<vmem>>, vector<256x128xbf16>
    %cst = arith.constant dense<0.000000e+00> : vector<8x128xf32>
    %3 = tpu.matmul %1, %2, %cst {dimension_numbers = #tpu.dot_dimension_numbers<[1], [0], [0], [1], [0, 0, 1, 1], [], []>} : vector<8x256xbf16>, vector<256x128xbf16>, vector<8x128xf32> -> vector<8x128xf32>
    %c0_3 = arith.constant 0 : index
    %c0_4 = arith.constant 0 : index
    %4 = vector.load %arg5[%c0_3, %c0_4] : memref<256x128xbf16, #tpu.memory_space<vmem>>, vector<256x128xbf16>
    %cst_5 = arith.constant dense<0.000000e+00> : vector<8x128xf32>
    %5 = tpu.matmul %1, %4, %cst_5 {dimension_numbers = #tpu.dot_dimension_numbers<[1], [0], [0], [1], [0, 0, 1, 1], [], []>} : vector<8x256xbf16>, vector<256x128xbf16>, vector<8x128xf32> -> vector<8x128xf32>
    %6 = vector.shape_cast %3 : vector<8x128xf32> to vector<2x4x128xf32>
    %7 = vector.shape_cast %5 : vector<8x128xf32> to vector<2x4x128xf32>
    %cst_6 = arith.constant 0.000000e+00 : f32
    %8 = vector.broadcast %cst_6 : f32 to vector<2x4x128xf32>
    %cst_7 = arith.constant 0.000000e+00 : f32
    %9 = vector.broadcast %cst_7 : f32 to vector<2x4x128xf32>
    %10 = vector.extract_strided_slice %6 {offsets = [0, 0, 0], sizes = [2, 1, 128], strides = [1, 1, 1]} : vector<2x4x128xf32> to vector<2x1x128xf32>
    %11 = vector.extract_strided_slice %7 {offsets = [0, 0, 0], sizes = [2, 1, 128], strides = [1, 1, 1]} : vector<2x4x128xf32> to vector<2x1x128xf32>
    %c0_8 = arith.constant 0 : index
    %c0_9 = arith.constant 0 : index
    %c0_10 = arith.constant 0 : index
    %12 = vector.load %arg2[%c0_8, %c0_9, %c0_10] : memref<4x4x128xf32, #tpu.memory_space<vmem>>, vector<1x4x128xf32>
    %13 = vector.shape_cast %12 : vector<1x4x128xf32> to vector<4x128xf32>
    %14 = vector.shape_cast %13 : vector<4x128xf32> to vector<1x4x128xf32>
    %c0_11 = arith.constant 0 : index
    %c0_12 = arith.constant 0 : index
    %c0_13 = arith.constant 0 : index
    %15 = vector.load %arg3[%c0_11, %c0_12, %c0_13] : memref<4x4x128xf32, #tpu.memory_space<vmem>>, vector<1x4x128xf32>
    %16 = vector.shape_cast %15 : vector<1x4x128xf32> to vector<4x128xf32>
    %17 = vector.shape_cast %16 : vector<4x128xf32> to vector<1x4x128xf32>
    %18 = vector.broadcast %10 : vector<2x1x128xf32> to vector<2x4x128xf32>
    %19 = vector.broadcast %14 : vector<1x4x128xf32> to vector<2x4x128xf32>
    %20 = arith.mulf %18, %19 : vector<2x4x128xf32>
    %21 = arith.addf %8, %20 : vector<2x4x128xf32>
    %22 = vector.broadcast %11 : vector<2x1x128xf32> to vector<2x4x128xf32>
    %23 = vector.broadcast %17 : vector<1x4x128xf32> to vector<2x4x128xf32>
    %24 = arith.mulf %22, %23 : vector<2x4x128xf32>
    %25 = arith.subf %21, %24 : vector<2x4x128xf32>
    %26 = vector.broadcast %10 : vector<2x1x128xf32> to vector<2x4x128xf32>
    %27 = vector.broadcast %17 : vector<1x4x128xf32> to vector<2x4x128xf32>
    %28 = arith.mulf %26, %27 : vector<2x4x128xf32>
    %29 = arith.subf %9, %28 : vector<2x4x128xf32>
    %30 = vector.broadcast %11 : vector<2x1x128xf32> to vector<2x4x128xf32>
    %31 = vector.broadcast %14 : vector<1x4x128xf32> to vector<2x4x128xf32>
    %32 = arith.mulf %30, %31 : vector<2x4x128xf32>
    %33 = arith.subf %29, %32 : vector<2x4x128xf32>
    %34 = vector.extract_strided_slice %6 {offsets = [0, 1, 0], sizes = [2, 1, 128], strides = [1, 1, 1]} : vector<2x4x128xf32> to vector<2x1x128xf32>
    %35 = vector.extract_strided_slice %7 {offsets = [0, 1, 0], sizes = [2, 1, 128], strides = [1, 1, 1]} : vector<2x4x128xf32> to vector<2x1x128xf32>
    %c1 = arith.constant 1 : index
    %c0_14 = arith.constant 0 : index
    %c0_15 = arith.constant 0 : index
    %36 = vector.load %arg2[%c1, %c0_14, %c0_15] : memref<4x4x128xf32, #tpu.memory_space<vmem>>, vector<1x4x128xf32>
    %37 = vector.shape_cast %36 : vector<1x4x128xf32> to vector<4x128xf32>
    %38 = vector.shape_cast %37 : vector<4x128xf32> to vector<1x4x128xf32>
    %c1_16 = arith.constant 1 : index
    %c0_17 = arith.constant 0 : index
    %c0_18 = arith.constant 0 : index
    %39 = vector.load %arg3[%c1_16, %c0_17, %c0_18] : memref<4x4x128xf32, #tpu.memory_space<vmem>>, vector<1x4x128xf32>
    %40 = vector.shape_cast %39 : vector<1x4x128xf32> to vector<4x128xf32>
    %41 = vector.shape_cast %40 : vector<4x128xf32> to vector<1x4x128xf32>
    %42 = vector.broadcast %34 : vector<2x1x128xf32> to vector<2x4x128xf32>
    %43 = vector.broadcast %38 : vector<1x4x128xf32> to vector<2x4x128xf32>
    %44 = arith.mulf %42, %43 : vector<2x4x128xf32>
    %45 = arith.addf %25, %44 : vector<2x4x128xf32>
    %46 = vector.broadcast %35 : vector<2x1x128xf32> to vector<2x4x128xf32>
    %47 = vector.broadcast %41 : vector<1x4x128xf32> to vector<2x4x128xf32>
    %48 = arith.mulf %46, %47 : vector<2x4x128xf32>
    %49 = arith.subf %45, %48 : vector<2x4x128xf32>
    %50 = vector.broadcast %34 : vector<2x1x128xf32> to vector<2x4x128xf32>
    %51 = vector.broadcast %41 : vector<1x4x128xf32> to vector<2x4x128xf32>
    %52 = arith.mulf %50, %51 : vector<2x4x128xf32>
    %53 = arith.subf %33, %52 : vector<2x4x128xf32>
    %54 = vector.broadcast %35 : vector<2x1x128xf32> to vector<2x4x128xf32>
    %55 = vector.broadcast %38 : vector<1x4x128xf32> to vector<2x4x128xf32>
    %56 = arith.mulf %54, %55 : vector<2x4x128xf32>
    %57 = arith.subf %53, %56 : vector<2x4x128xf32>
    %58 = vector.extract_strided_slice %6 {offsets = [0, 2, 0], sizes = [2, 1, 128], strides = [1, 1, 1]} : vector<2x4x128xf32> to vector<2x1x128xf32>
    %59 = vector.extract_strided_slice %7 {offsets = [0, 2, 0], sizes = [2, 1, 128], strides = [1, 1, 1]} : vector<2x4x128xf32> to vector<2x1x128xf32>
    %c2 = arith.constant 2 : index
    %c0_19 = arith.constant 0 : index
    %c0_20 = arith.constant 0 : index
    %60 = vector.load %arg2[%c2, %c0_19, %c0_20] : memref<4x4x128xf32, #tpu.memory_space<vmem>>, vector<1x4x128xf32>
    %61 = vector.shape_cast %60 : vector<1x4x128xf32> to vector<4x128xf32>
    %62 = vector.shape_cast %61 : vector<4x128xf32> to vector<1x4x128xf32>
    %c2_21 = arith.constant 2 : index
    %c0_22 = arith.constant 0 : index
    %c0_23 = arith.constant 0 : index
    %63 = vector.load %arg3[%c2_21, %c0_22, %c0_23] : memref<4x4x128xf32, #tpu.memory_space<vmem>>, vector<1x4x128xf32>
    %64 = vector.shape_cast %63 : vector<1x4x128xf32> to vector<4x128xf32>
    %65 = vector.shape_cast %64 : vector<4x128xf32> to vector<1x4x128xf32>
    %66 = vector.broadcast %58 : vector<2x1x128xf32> to vector<2x4x128xf32>
    %67 = vector.broadcast %62 : vector<1x4x128xf32> to vector<2x4x128xf32>
    %68 = arith.mulf %66, %67 : vector<2x4x128xf32>
    %69 = arith.addf %49, %68 : vector<2x4x128xf32>
    %70 = vector.broadcast %59 : vector<2x1x128xf32> to vector<2x4x128xf32>
    %71 = vector.broadcast %65 : vector<1x4x128xf32> to vector<2x4x128xf32>
    %72 = arith.mulf %70, %71 : vector<2x4x128xf32>
    %73 = arith.subf %69, %72 : vector<2x4x128xf32>
    %74 = vector.broadcast %58 : vector<2x1x128xf32> to vector<2x4x128xf32>
    %75 = vector.broadcast %65 : vector<1x4x128xf32> to vector<2x4x128xf32>
    %76 = arith.mulf %74, %75 : vector<2x4x128xf32>
    %77 = arith.subf %57, %76 : vector<2x4x128xf32>
    %78 = vector.broadcast %59 : vector<2x1x128xf32> to vector<2x4x128xf32>
    %79 = vector.broadcast %62 : vector<1x4x128xf32> to vector<2x4x128xf32>
    %80 = arith.mulf %78, %79 : vector<2x4x128xf32>
    %81 = arith.subf %77, %80 : vector<2x4x128xf32>
    %82 = vector.extract_strided_slice %6 {offsets = [0, 3, 0], sizes = [2, 1, 128], strides = [1, 1, 1]} : vector<2x4x128xf32> to vector<2x1x128xf32>
    %83 = vector.extract_strided_slice %7 {offsets = [0, 3, 0], sizes = [2, 1, 128], strides = [1, 1, 1]} : vector<2x4x128xf32> to vector<2x1x128xf32>
    %c3 = arith.constant 3 : index
    %c0_24 = arith.constant 0 : index
    %c0_25 = arith.constant 0 : index
    %84 = vector.load %arg2[%c3, %c0_24, %c0_25] : memref<4x4x128xf32, #tpu.memory_space<vmem>>, vector<1x4x128xf32>
    %85 = vector.shape_cast %84 : vector<1x4x128xf32> to vector<4x128xf32>
    %86 = vector.shape_cast %85 : vector<4x128xf32> to vector<1x4x128xf32>
    %c3_26 = arith.constant 3 : index
    %c0_27 = arith.constant 0 : index
    %c0_28 = arith.constant 0 : index
    %87 = vector.load %arg3[%c3_26, %c0_27, %c0_28] : memref<4x4x128xf32, #tpu.memory_space<vmem>>, vector<1x4x128xf32>
    %88 = vector.shape_cast %87 : vector<1x4x128xf32> to vector<4x128xf32>
    %89 = vector.shape_cast %88 : vector<4x128xf32> to vector<1x4x128xf32>
    %90 = vector.broadcast %82 : vector<2x1x128xf32> to vector<2x4x128xf32>
    %91 = vector.broadcast %86 : vector<1x4x128xf32> to vector<2x4x128xf32>
    %92 = arith.mulf %90, %91 : vector<2x4x128xf32>
    %93 = arith.addf %73, %92 : vector<2x4x128xf32>
    %94 = vector.broadcast %83 : vector<2x1x128xf32> to vector<2x4x128xf32>
    %95 = vector.broadcast %89 : vector<1x4x128xf32> to vector<2x4x128xf32>
    %96 = arith.mulf %94, %95 : vector<2x4x128xf32>
    %97 = arith.subf %93, %96 : vector<2x4x128xf32>
    %98 = vector.broadcast %82 : vector<2x1x128xf32> to vector<2x4x128xf32>
    %99 = vector.broadcast %89 : vector<1x4x128xf32> to vector<2x4x128xf32>
    %100 = arith.mulf %98, %99 : vector<2x4x128xf32>
    %101 = arith.subf %81, %100 : vector<2x4x128xf32>
    %102 = vector.broadcast %83 : vector<2x1x128xf32> to vector<2x4x128xf32>
    %103 = vector.broadcast %86 : vector<1x4x128xf32> to vector<2x4x128xf32>
    %104 = arith.mulf %102, %103 : vector<2x4x128xf32>
    %105 = arith.subf %101, %104 : vector<2x4x128xf32>
    %106 = vector.shape_cast %97 : vector<2x4x128xf32> to vector<8x128xf32>
    %107 = arith.truncf %106 : vector<8x128xf32> to vector<8x128xbf16>
    %108 = vector.shape_cast %105 : vector<2x4x128xf32> to vector<8x128xf32>
    %109 = arith.truncf %108 : vector<8x128xf32> to vector<8x128xbf16>
    %c0_29 = arith.constant 0 : index
    %c0_30 = arith.constant 0 : index
    %110 = vector.load %arg6[%c0_29, %c0_30] : memref<128x256xbf16, #tpu.memory_space<vmem>>, vector<128x256xbf16>
    %cst_31 = arith.constant dense<0.000000e+00> : vector<8x256xf32>
    %111 = tpu.matmul %107, %110, %cst_31 {dimension_numbers = #tpu.dot_dimension_numbers<[1], [0], [0], [1], [0, 0, 1, 1], [], []>} : vector<8x128xbf16>, vector<128x256xbf16>, vector<8x256xf32> -> vector<8x256xf32>
    %c0_32 = arith.constant 0 : index
    %c0_33 = arith.constant 0 : index
    %112 = vector.load %arg7[%c0_32, %c0_33] : memref<128x256xbf16, #tpu.memory_space<vmem>>, vector<128x256xbf16>
    %cst_34 = arith.constant dense<0.000000e+00> : vector<8x256xf32>
    %113 = tpu.matmul %109, %112, %cst_34 {dimension_numbers = #tpu.dot_dimension_numbers<[1], [0], [0], [1], [0, 0, 1, 1], [], []>} : vector<8x128xbf16>, vector<128x256xbf16>, vector<8x256xf32> -> vector<8x256xf32>
    %114 = arith.addf %111, %113 : vector<8x256xf32>
    %c0_35 = arith.constant 0 : index
    %c0_36 = arith.constant 0 : index
    %115 = vector.load %arg1[%c0_35, %c0_36] : memref<8x256xf32, #tpu.memory_space<vmem>>, vector<8x256xf32>
    %116 = arith.addf %115, %114 : vector<8x256xf32>
    %c0_37 = arith.constant 0 : index
    %c0_38 = arith.constant 0 : index
    %117 = vector.load %arg8[%c0_37, %c0_38] : memref<8x256xf32, #tpu.memory_space<vmem>>, vector<8x256xf32>
    tpu.vector_store %arg8[%c0_37, %c0_38], %116 {strides = array<i32>} : memref<8x256xf32, #tpu.memory_space<vmem>>, vector<8x256xf32>,
    return
  }
  func.func @transform_0(%arg0: i32) -> (i32, i32) {
    %c0_i32 = arith.constant 0 : i32
    %c0_i32_0 = arith.constant 0 : i32
    return %arg0, %c0_i32 : i32, i32
  }
  func.func @transform_1(%arg0: i32) -> (i32, i32, i32) {
    %c0_i32 = arith.constant 0 : i32
    %c0_i32_0 = arith.constant 0 : i32
    %c0_i32_1 = arith.constant 0 : i32
    %c0_i32_2 = arith.constant 0 : i32
    return %c0_i32, %c0_i32_0, %c0_i32_1 : i32, i32, i32
  }
  func.func @transform_2(%arg0: i32) -> (i32, i32, i32) {
    %c0_i32 = arith.constant 0 : i32
    %c0_i32_0 = arith.constant 0 : i32
    %c0_i32_1 = arith.constant 0 : i32
    %c0_i32_2 = arith.constant 0 : i32
    return %c0_i32, %c0_i32_0, %c0_i32_1 : i32, i32, i32
  }
  func.func @transform_3(%arg0: i32) -> (i32, i32) {
    %c0_i32 = arith.constant 0 : i32
    %c0_i32_0 = arith.constant 0 : i32
    %c0_i32_1 = arith.constant 0 : i32
    return %c0_i32, %c0_i32_0 : i32, i32
  }
  func.func @transform_4(%arg0: i32) -> (i32, i32) {
    %c0_i32 = arith.constant 0 : i32
    %c0_i32_0 = arith.constant 0 : i32
    %c0_i32_1 = arith.constant 0 : i32
    return %c0_i32, %c0_i32_0 : i32, i32
  }
  func.func @transform_5(%arg0: i32) -> (i32, i32) {
    %c0_i32 = arith.constant 0 : i32
    %c0_i32_0 = arith.constant 0 : i32
    %c0_i32_1 = arith.constant 0 : i32
    return %c0_i32, %c0_i32_0 : i32, i32
  }
  func.func @transform_6(%arg0: i32) -> (i32, i32) {
    %c0_i32 = arith.constant 0 : i32
    %c0_i32_0 = arith.constant 0 : i32
    %c0_i32_1 = arith.constant 0 : i32
    return %c0_i32, %c0_i32_0 : i32, i32
  }
  func.func @transform_7(%arg0: i32) -> (i32, i32) {
    %c0_i32 = arith.constant 0 : i32
    %c0_i32_0 = arith.constant 0 : i32
    return %arg0, %c0_i32 : i32, i32
  }
}

</mosaic_0001>

<bundles_post_ra>
// kernel: tpu_custom_call.1
= control target key start
LH: loop header
LB: loop body
LE: loop exit
PB: predicated region body
PF: predicated region fallthrough
CT: control target
= control target key end

     0   :  { %12 = vsyncpa [#allocation3], 0  ;;  %s1479_s0 = inlined_call_operand.hbm [shape: f32[8,256], index: 0, kind: input, shape index: {}]   ;;  %s1480_s1 = inlined_call_operand.hbm [shape: f32[4,4,128], index: 1, kind: input, shape index: {}]   ;;  %s1481_s2 = inlined_call_operand.hbm [shape: f32[4,4,128], index: 2, kind: input, shape index: {}]   ;;  %s1482_s3 = inlined_call_operand.hbm [shape: bf16[256,128], index: 3, kind: input, shape index: {}]   ;;  %s1483_s4 = inlined_call_operand.hbm [shape: bf16[256,128], index: 4, kind: input, shape index: {}]   ;;  %s1484_s5 = inlined_call_operand.hbm [shape: bf16[128,256], index: 5, kind: input, shape index: {}]   ;;  %s1485_s6 = inlined_call_operand.hbm [shape: bf16[128,256], index: 6, kind: input, shape index: {}]   ;;  %s1486_s7 = inlined_call_operand.hbm [shape: f32[8,256], index: 7, kind: output, shape index: {}]  }
   0x1   :  { %13 = vsyncpa [#allocation6], 0 }
   0x2   :  { %14 = vsyncpa [#allocation9], 0 }
   0x3   :  { %15 = vsyncpa [#allocation12], 0 }
   0x4   :  { %16 = vsyncpa [#allocation4], 0  ;;  %s1302_s24 = smov [#allocation5]   ;;  %s1116_s28 = scalar_lea.hbm %s1480_s1, 256 }
   0x5   :  { %s32_s25 = sshll.u32 %s1302_s24, 4  ;;  %p1117_p0 = scmp.ne.s32.totalorder %s1480_s1, %s1116_s28  ;;  %s33_s25 = int_to_ptr.vmem [resolvable:$true] %s32_s25 }
   0x6   :  { %p1120_p1 = scmp.lt.u32.totalorder %s1116_s28, %s1480_s1 }
   0x8   :  { %p1122_p2 = pnand %p1120_p1, %p1117_p0 }
   0xa   :  { %1125 = shalt.err (!%p1122_p2)
}
   0xb   :  { %s1126_s10 = scalar_lea.vmem %s33_s25, 256  ;;  %p1131_p4 = scmp.lt.s32.totalorder %s33_s25, %s33_s25 }
   0xc   :  { %p1127_p3 = scmp.ne.s32.totalorder %s33_s25, %s1126_s10  ;;  %p1132_p5 = scmp.lt.s32.totalorder %s1126_s10, %s1126_s10 }
   0xe   :  { %p1133_p6 = por %p1132_p5, %p1131_p4 }
  0x10   :  { %p1134_p7 = pnand %p1133_p6, %p1127_p3 }
  0x12   :  { %1137 = shalt.err (!%p1134_p7)
}
  0x13   :  { %s1303_s11 = smov 64   ;;  %s1304_s12 = smov 4  }
  0x14   :  { %38 = dma.hbm_to_vmem [thread:$0]  %s1480_s1, 256, %s33_s25, [#allocation6], %s1303_s11, %s1303_s11, %s1304_s12  }
  0x15   :  { %s1305_s15 = smov [#allocation8]   ;;  %s1306_s17 = smov [#allocation11]  }
  0x16   :  { %s56_s16 = sshll.u32 %s1305_s15, 4  ;;  %s80_s18 = sshll.u32 %s1306_s17, 4  ;;  %s57_s16 = int_to_ptr.vmem [resolvable:$true] %s56_s16  ;;  %s81_s18 = int_to_ptr.vmem [resolvable:$true] %s80_s18 }
  0x17   :  { %s1138_s21 = scalar_lea.hbm %s1482_s3, 2048 }
  0x18   :  { %p1139_p8 = scmp.ne.s32.totalorder %s1482_s3, %s1138_s21  ;;  %p1142_p9 = scmp.lt.u32.totalorder %s1138_s21, %s1482_s3 }
  0x1a   :  { %p1144_p10 = pnand %p1142_p9, %p1139_p8 }
  0x1c   :  { %1147 = shalt.err (!%p1144_p10)
}
  0x1d   :  { %s1148_s1 = scalar_lea.vmem %s57_s16, 2048  ;;  %p1153_p12 = scmp.lt.s32.totalorder %s57_s16, %s57_s16 }
  0x1e   :  { %p1149_p11 = scmp.ne.s32.totalorder %s57_s16, %s1148_s1  ;;  %p1154_p13 = scmp.lt.s32.totalorder %s1148_s1, %s1148_s1 }
  0x20   :  { %p1155_p0 = por %p1154_p13, %p1153_p12 }
  0x22   :  { %p1156_p1 = pnand %p1155_p0, %p1149_p11 }
  0x24   :  { %1159 = shalt.err (!%p1156_p1)
}
  0x25   :  { %62 = dma.hbm_to_vmem [thread:$0]  %s1482_s3, 2048, %s57_s16, [#allocation9], %s1303_s11, %s1303_s11, %s1304_s12  }
  0x26   :  { %s1160_s30 = scalar_lea.hbm %s1484_s5, 2048 }
  0x27   :  { %p1161_p2 = scmp.ne.s32.totalorder %s1484_s5, %s1160_s30  ;;  %p1164_p3 = scmp.lt.u32.totalorder %s1160_s30, %s1484_s5 }
  0x29   :  { %p1166_p4 = pnand %p1164_p3, %p1161_p2 }
  0x2b   :  { %1169 = shalt.err (!%p1166_p4)
}
  0x2c   :  { %s1170_s14 = scalar_lea.vmem %s81_s18, 2048  ;;  %p1175_p6 = scmp.lt.s32.totalorder %s81_s18, %s81_s18 }
  0x2d   :  { %p1171_p5 = scmp.ne.s32.totalorder %s81_s18, %s1170_s14  ;;  %p1176_p7 = scmp.lt.s32.totalorder %s1170_s14, %s1170_s14 }
  0x2f   :  { %p1177_p8 = por %p1176_p7, %p1175_p6 }
  0x31   :  { %p1178_p9 = pnand %p1177_p8, %p1171_p5 }
  0x33   :  { %1181 = shalt.err (!%p1178_p9)
}
  0x34   :  { %s1307_s3 = smov 128   ;;  %s1308_s15 = smov 8  }
  0x35   :  { %86 = dma.hbm_to_vmem [thread:$0]  %s1484_s5, 2048, %s81_s18, [#allocation12], %s1307_s3, %s1307_s3, %s1308_s15  }
  0x36   :  { %s1309_s19 = smov [#allocation2]   ;;  %s1310_s21 = smov [#allocation7]  }
  0x37   :  { %s23_s20 = sshll.u32 %s1309_s19, 4  ;;  %s44_s22 = sshll.u32 %s1310_s21, 4  ;;  %s24_s20 = int_to_ptr.vmem [resolvable:$true] %s23_s20  ;;  %s45_s22 = int_to_ptr.vmem [resolvable:$true] %s44_s22 }
  0x38   :  { %s1182_s26 = scalar_lea.hbm %s1479_s0, 256 }
  0x39   :  { %p1183_p10 = scmp.ne.s32.totalorder %s1479_s0, %s1182_s26  ;;  %p1186_p11 = scmp.lt.u32.totalorder %s1182_s26, %s1479_s0 }
  0x3b   :  { %p1188_p12 = pnand %p1186_p11, %p1183_p10 }
  0x3d   :  { %1191 = shalt.err (!%p1188_p12)
}
  0x3e   :  { %s1192_s5 = scalar_lea.vmem %s24_s20, 256  ;;  %p1197_p0 = scmp.lt.s32.totalorder %s24_s20, %s24_s20 }
  0x3f   :  { %p1193_p13 = scmp.ne.s32.totalorder %s24_s20, %s1192_s5  ;;  %p1198_p1 = scmp.lt.s32.totalorder %s1192_s5, %s1192_s5 }
  0x41   :  { %p1199_p2 = por %p1198_p1, %p1197_p0 }
  0x43   :  { %p1200_p3 = pnand %p1199_p2, %p1193_p13 }
  0x45   :  { %1203 = shalt.err (!%p1200_p3)
}
  0x46   :  { %26 = dma.hbm_to_vmem [thread:$0]  %s1479_s0, 256, %s24_s20, [#allocation3]  }
  0x47   :  { %s1204_s9 = scalar_lea.hbm %s1481_s2, 256 }
  0x48   :  { %p1205_p4 = scmp.ne.s32.totalorder %s1481_s2, %s1204_s9  ;;  %p1208_p5 = scmp.lt.u32.totalorder %s1204_s9, %s1481_s2 }
  0x4a   :  { %p1210_p6 = pnand %p1208_p5, %p1205_p4 }
  0x4c   :  { %1213 = shalt.err (!%p1210_p6)
}
  0x4d   :  { %s1214_s17 = scalar_lea.vmem %s45_s22, 256  ;;  %p1219_p8 = scmp.lt.s32.totalorder %s45_s22, %s45_s22 }
  0x4e   :  { %p1215_p7 = scmp.ne.s32.totalorder %s45_s22, %s1214_s17  ;;  %p1220_p9 = scmp.lt.s32.totalorder %s1214_s17, %s1214_s17 }
  0x50   :  { %p1221_p10 = por %p1220_p9, %p1219_p8 }
  0x52   :  { %p1222_p11 = pnand %p1221_p10, %p1215_p7 }
  0x54   :  { %1225 = shalt.err (!%p1222_p11)
}
  0x55   :  { %50 = dma.hbm_to_vmem [thread:$0]  %s1481_s2, 256, %s45_s22, [#allocation6], %s1303_s11, %s1303_s11, %s1304_s12  }
  0x56   :  { %s1311_s20 = smov [#allocation10]   ;;  %s1312_s23 = smov [#allocation13]  }
  0x57   :  { %s68_s21 = sshll.u32 %s1311_s20, 4  ;;  %s92_s24 = sshll.u32 %s1312_s23, 4  ;;  %s69_s21 = int_to_ptr.vmem [resolvable:$true] %s68_s21  ;;  %s93_s24 = int_to_ptr.vmem [resolvable:$true] %s92_s24 }
  0x58   :  { %s1226_s25 = scalar_lea.hbm %s1483_s4, 2048 }
  0x59   :  { %p1227_p12 = scmp.ne.s32.totalorder %s1483_s4, %s1226_s25  ;;  %p1230_p13 = scmp.lt.u32.totalorder %s1226_s25, %s1483_s4 }
  0x5b   :  { %p1232_p0 = pnand %p1230_p13, %p1227_p12 }
  0x5d   :  { %1235 = shalt.err (!%p1232_p0)
}
  0x5e   :  { %s1236_s2 = scalar_lea.vmem %s69_s21, 2048  ;;  %p1241_p2 = scmp.lt.s32.totalorder %s69_s21, %s69_s21 }
  0x5f   :  { %p1237_p1 = scmp.ne.s32.totalorder %s69_s21, %s1236_s2  ;;  %p1242_p3 = scmp.lt.s32.totalorder %s1236_s2, %s1236_s2 }
  0x61   :  { %p1243_p4 = por %p1242_p3, %p1241_p2 }
  0x63   :  { %p1244_p5 = pnand %p1243_p4, %p1237_p1 }
  0x65   :  { %1247 = shalt.err (!%p1244_p5)
}
  0x66   :  { %74 = dma.hbm_to_vmem [thread:$0]  %s1483_s4, 2048, %s69_s21, [#allocation9], %s1303_s11, %s1303_s11, %s1304_s12  }
  0x67   :  { %s1248_s9 = scalar_lea.hbm %s1485_s6, 2048 }
  0x68   :  { %p1249_p6 = scmp.ne.s32.totalorder %s1485_s6, %s1248_s9  ;;  %p1252_p7 = scmp.lt.u32.totalorder %s1248_s9, %s1485_s6 }
  0x6a   :  { %p1254_p8 = pnand %p1252_p7, %p1249_p6 }
  0x6c   :  { %1257 = shalt.err (!%p1254_p8)
}
  0x6d   :  { %s1258_s17 = scalar_lea.vmem %s93_s24, 2048  ;;  %p1263_p10 = scmp.lt.s32.totalorder %s93_s24, %s93_s24 }
  0x6e   :  { %p1259_p9 = scmp.ne.s32.totalorder %s93_s24, %s1258_s17  ;;  %p1264_p11 = scmp.lt.s32.totalorder %s1258_s17, %s1258_s17 }
  0x70   :  { %p1265_p12 = por %p1264_p11, %p1263_p10 }
  0x72   :  { %p1266_p13 = pnand %p1265_p12, %p1259_p9 }
  0x74   :  { %1269 = shalt.err (!%p1266_p13)
}
  0x75   :  { %98 = dma.hbm_to_vmem [thread:$0]  %s1485_s6, 2048, %s93_s24, [#allocation12], %s1307_s3, %s1307_s3, %s1308_s15  }
  0x76   :  { %1292 = dma.done.wait [#allocation3], 256  }
  0x77   :  { %1293 = vsyncadd [#allocation3], 4294967040 }
  0x78   :  { %1294 = dma.done.wait [#allocation6], 512  }
  0x79   :  { %1295 = vsyncadd [#allocation6], 4294966784 }
  0x7a   :  { %1296 = dma.done.wait [#allocation9], 4096  }
  0x7b   :  { %1297 = vsyncadd [#allocation9], 4294963200 }
  0x7c   :  { %1298 = dma.done.wait [#allocation12], 4096  }
  0x7d   :  { %1299 = vsyncadd [#allocation12], 4294963200  ;;  %v1036_v0 = vld [vmem:[#allocation8 + $0x40] sm:$0xff]   ;;  %v1040_v4 = vld [vmem:[#allocation8 + $0x48] sm:$0xff]   ;;  %v1313_v61 = vmov 0   ;;  %s1314_s6 = smov [#allocation14]  }
  0x7e   :  { %v1037_v1 = vld [vmem:[#allocation10 + $0x40] sm:$0xff]   ;;  %979 = vmatprep.subr.bf16.mxu0 %v1036_v0  ;;  %v1041_v5 = vld [vmem:[#allocation10 + $0x48] sm:$0xff]   ;;  %v1044_v8 = vld [vmem:[#allocation8 + $0x50] sm:$0xff]   ;;  %s903_s12 = sshll.u32 %s1314_s6, 4  ;;  %s904_s12 = int_to_ptr.vmem [resolvable:$true] %s903_s12 }
  0x7f   :  { %v1038_v2 = vld [vmem:[#allocation8] sm:$0xff]   ;;  %1001 = vmatprep.subr.bf16.mxu1 %v1037_v1  ;;  %v1042_v6 = vld [vmem:[#allocation8 + $0x8] sm:$0xff]   ;;  %v1045_v9 = vld [vmem:[#allocation10 + $0x50] sm:$0xff]   ;;  %s1270_s3 = scalar_lea.vmem %s904_s12, 256  ;;  %p1275_p1 = scmp.lt.s32.totalorder %s904_s12, %s904_s12 }
  0x80   :  { %v1039_v3 = vld [vmem:[#allocation10] sm:$0xff]   ;;  %980 = vmatpush3.bf16.msra.mxu0 %v1038_v2  ;;  %v1043_v7 = vld [vmem:[#allocation10 + $0x8] sm:$0xff]   ;;  %v1046_v10 = vld [vmem:[#allocation8 + $0x10] sm:$0xff]   ;;  %p1271_p0 = scmp.ne.s32.totalorder %s904_s12, %s1270_s3  ;;  %p1276_p2 = scmp.lt.s32.totalorder %s1270_s3, %s1270_s3 }
  0x81   :  { %1002 = vmatpush3.bf16.msra.mxu1 %v1039_v3  ;;  %981 = vmatprep.subr.bf16.mxu0 %v1040_v4  ;;  %v1047_v11 = vld [vmem:[#allocation10 + $0x10] sm:$0xff]   ;;  %v1048_v12 = vld [vmem:[#allocation8 + $0x58] sm:$0xff]   ;;  %v1052_v16 = vld [vmem:[#allocation8 + $0x60] sm:$0xff]  }
  0x82   :  { %1003 = vmatprep.subr.bf16.mxu1 %v1041_v5  ;;  %v1049_v13 = vld [vmem:[#allocation10 + $0x58] sm:$0xff]   ;;  %v1053_v17 = vld [vmem:[#allocation10 + $0x60] sm:$0xff]   ;;  %v1056_v20 = vld [vmem:[#allocation8 + $0x68] sm:$0xff]   ;;  %v469_v5 = vlaneseq  ;;  %p1277_p3 = por %p1276_p2, %p1275_p1 }
  0x83   :  { %v1050_v14 = vld [vmem:[#allocation8 + $0x18] sm:$0xff]   ;;  %v1054_v18 = vld [vmem:[#allocation8 + $0x20] sm:$0xff]   ;;  %v1057_v21 = vld [vmem:[#allocation10 + $0x68] sm:$0xff]  }
  0x84   :  { %982 = vmatpush3.bf16.msra.mxu0 %v1042_v6  ;;  %v1051_v15 = vld [vmem:[#allocation10 + $0x18] sm:$0xff]   ;;  %v1055_v19 = vld [vmem:[#allocation10 + $0x20] sm:$0xff]   ;;  %v1058_v22 = vld [vmem:[#allocation8 + $0x28] sm:$0xff]   ;;  %v470_v6 = vshrl.u32 %v469_v5, 7  ;;  %p1278_p4 = pnand %p1277_p3, %p1271_p0 }
  0x85   :  { %1004 = vmatpush3.bf16.msra.mxu1 %v1043_v7  ;;  %983 = vmatprep.subr.bf16.mxu0 %v1044_v8  ;;  %v1059_v23 = vld [vmem:[#allocation10 + $0x28] sm:$0xff]   ;;  %v1060_v24 = vld [vmem:[#allocation8 + $0x70] sm:$0xff]   ;;  %v1064_v28 = vld [vmem:[#allocation8 + $0x78] sm:$0xff]  }
  0x86   :  { %1005 = vmatprep.subr.bf16.mxu1 %v1045_v9  ;;  %v1061_v25 = vld [vmem:[#allocation10 + $0x70] sm:$0xff]   ;;  %v1065_v29 = vld [vmem:[#allocation10 + $0x78] sm:$0xff]   ;;  %v1068_v36 = vld [vmem:[#allocation11] ss:$8 sps:$4 sm:$0xff]   ;;  %v471_v9 = vsub.s32 0, %v470_v6 }
  0x87   :  { %v1062_v26 = vld [vmem:[#allocation8 + $0x30] sm:$0xff]   ;;  %v1066_v30 = vld [vmem:[#allocation8 + $0x38] sm:$0xff]   ;;  %v1070_v37 = vld [vmem:[#allocation11 + $0x4] ss:$8 sps:$4 sm:$0xff]  }
  0x88   :  { %984 = vmatpush3.bf16.msra.mxu0 %v1046_v10  ;;  %v1063_v27 = vld [vmem:[#allocation10 + $0x30] sm:$0xff]   ;;  %v1067_v31 = vld [vmem:[#allocation10 + $0x38] sm:$0xff]   ;;  %v1071_v38 = vld [vmem:[#allocation13] ss:$8 sps:$4 sm:$0xff]  }
  0x89   :  { %1006 = vmatpush3.bf16.msra.mxu1 %v1047_v11  ;;  %985 = vmatprep.subr.bf16.mxu0 %v1048_v12  ;;  %v1457_v32 = vld [vmem:[#allocation2 + $0x8] sm:$0xff]  ;;  %v1459_v33 = vld [vmem:[#allocation2] sm:$0xff]  ;;  %v1073_v39 = vld [vmem:[#allocation13 + $0x4] ss:$8 sps:$4 sm:$0xff]  }
  0x8a   :  { %1007 = vmatprep.subr.bf16.mxu1 %v1049_v13  ;;  %v124_v34 = vpack.c.bf16 %v1457_v32, %v1457_v32  ;;  %v123_v35 = vpack.c.bf16 %v1459_v33, %v1459_v33  ;;  %v1076_v40 = vld [vmem:[#allocation11 + $0x14] ss:$8 sps:$4 sm:$0xff]   ;;  %v1074_v41 = vld [vmem:[#allocation11 + $0x10] ss:$8 sps:$4 sm:$0xff]   ;;  %v1082_v44 = vld [vmem:[#allocation11 + $0x24] ss:$8 sps:$4 sm:$0xff]  }
  0x8b   :  { %v1079_v42 = vld [vmem:[#allocation13 + $0x14] ss:$8 sps:$4 sm:$0xff]   ;;  %v1077_v43 = vld [vmem:[#allocation13 + $0x10] ss:$8 sps:$4 sm:$0xff]   ;;  %v1080_v45 = vld [vmem:[#allocation11 + $0x20] ss:$8 sps:$4 sm:$0xff]  }
  0x8c   :  { %986 = vmatpush3.bf16.msra.mxu0 %v1050_v14  ;;  %285 = vmatprep.mubr.bf16.mxu0 %v124_v34  ;;  %v1085_v46 = vld [vmem:[#allocation13 + $0x24] ss:$8 sps:$4 sm:$0xff]   ;;  %v1083_v47 = vld [vmem:[#allocation13 + $0x20] ss:$8 sps:$4 sm:$0xff]   ;;  %v1088_v48 = vld [vmem:[#allocation11 + $0x34] ss:$8 sps:$4 sm:$0xff]  }
  0x8d   :  { %1008 = vmatpush3.bf16.msra.mxu1 %v1051_v15  ;;  %987 = vmatprep.subr.bf16.mxu0 %v1052_v16  ;;  %v1086_v49 = vld [vmem:[#allocation11 + $0x30] ss:$8 sps:$4 sm:$0xff]   ;;  %v1091_v50 = vld [vmem:[#allocation13 + $0x34] ss:$8 sps:$4 sm:$0xff]   ;;  %v1092_v52 = vld [vmem:[#allocation11 + $0x40] ss:$8 sps:$4 sm:$0xff]  }
  0x8e   :  { %1009 = vmatprep.subr.bf16.mxu1 %v1053_v17  ;;  %453 = vmatprep.mubr.bf16.mxu1 %v124_v34  ;;  %v1089_v51 = vld [vmem:[#allocation13 + $0x30] ss:$8 sps:$4 sm:$0xff]   ;;  %v1094_v53 = vld [vmem:[#allocation11 + $0x44] ss:$8 sps:$4 sm:$0xff]   ;;  %v1095_v55 = vld [vmem:[#allocation13 + $0x40] ss:$8 sps:$4 sm:$0xff]  }
  0x8f   :  { %v1097_v54 = vld [vmem:[#allocation13 + $0x44] ss:$8 sps:$4 sm:$0xff]   ;;  %v1100_v56 = vld [vmem:[#allocation11 + $0x54] ss:$8 sps:$4 sm:$0xff]   ;;  %v1098_v58 = vld [vmem:[#allocation11 + $0x50] ss:$8 sps:$4 sm:$0xff]  }
  0x90   :  { %988 = vmatpush3.bf16.msra.mxu0 %v1054_v18  ;;  %v1103_v57 = vld [vmem:[#allocation13 + $0x54] ss:$8 sps:$4 sm:$0xff]   ;;  %v1106_v59 = vld [vmem:[#allocation11 + $0x64] ss:$8 sps:$4 sm:$0xff]   ;;  %v1101_v60 = vld [vmem:[#allocation13 + $0x50] ss:$8 sps:$4 sm:$0xff]  }
  0x91   :  { %1010 = vmatpush3.bf16.msra.mxu1 %v1055_v19  ;;  %989 = vmatprep.subr.bf16.mxu0 %v1056_v20  ;;  %v1109_v62 = vld [vmem:[#allocation13 + $0x64] ss:$8 sps:$4 sm:$0xff]   ;;  %v1104_v63 = vld [vmem:[#allocation11 + $0x60] ss:$8 sps:$4 sm:$0xff]   ;;  %v1112_v0 = vld [vmem:[#allocation11 + $0x74] ss:$8 sps:$4 sm:$0xff]  }
  0x92   :  { %1011 = vmatprep.subr.bf16.mxu1 %v1057_v21  ;;  %v1107_v1 = vld [vmem:[#allocation13 + $0x60] ss:$8 sps:$4 sm:$0xff]   ;;  %v1115_v2 = vld [vmem:[#allocation13 + $0x74] ss:$8 sps:$4 sm:$0xff]   ;;  %v1110_v3 = vld [vmem:[#allocation11 + $0x70] ss:$8 sps:$4 sm:$0xff]  }
  0x93   :  { %v1113_v4 = vld [vmem:[#allocation13 + $0x70] ss:$8 sps:$4 sm:$0xff]   ;;  %v507_v13 = vsub.s32 1, %v470_v6  ;;  %v467_v21 = vld [vmem:[#allocation5] sm:$0xf] }
  0x94   :  { %990 = vmatpush3.bf16.msra.mxu0 %v1058_v22  ;;  %v468_v17 = vld [vmem:[#allocation7] sm:$0xf]  ;;  %v504_v34 = vld [vmem:[#allocation7 + $0x4] sm:$0xf] }
  0x95   :  { %1012 = vmatpush3.bf16.msra.mxu1 %v1059_v23  ;;  %991 = vmatprep.subr.bf16.mxu0 %v1060_v24  ;;  %v543_v23 = vsub.s32 2, %v470_v6  ;;  %v579_v24 = vsub.s32 3, %v470_v6 }
  0x96   :  { %1013 = vmatprep.subr.bf16.mxu1 %v1061_v25 }
  0x98   :  { %992 = vmatpush3.bf16.msra.mxu0 %v1062_v26 }
  0x99   :  { %1014 = vmatpush3.bf16.msra.mxu1 %v1063_v27  ;;  %993 = vmatprep.subr.bf16.mxu0 %v1064_v28 }
  0x9a   :  { %1015 = vmatprep.subr.bf16.mxu1 %v1065_v29 }
  0x9c   :  { %994 = vmatpush3.bf16.msra.mxu0 %v1066_v30 }
  0x9d   :  { %1016 = vmatpush3.bf16.msra.mxu1 %v1067_v31  ;;  %731 = vmatprep.subr.bf16.mxu0 %v1073_v39  ;;  %v502_v31 = vld [vmem:[#allocation5 + $0x4] sm:$0xf] }
  0x9e   :  { %852 = vmatprep.subr.bf16.mxu1 %v1070_v37 }
  0x9f   :  { %286 = vmatmul.mubr.bf16.vlgmr.msra.gmra.mrb[0].mxu0 %v123_v35 }
  0xa0   :  { %454 = vmatmul.mubr.bf16.vlgmr.msra.gmra.mrb[0].mxu1 %v123_v35  ;;  %732 = vmatpush1.bf16.msra.mxu0 %v1071_v38 }
  0xa1   :  { %853 = vmatpush1.bf16.msra.mxu1 %v1068_v36  ;;  %733 = vmatprep.subr.bf16.mxu0 %v1079_v42 }
  0xa2   :  { %854 = vmatprep.subr.bf16.mxu1 %v1076_v40  ;;  %884 = vmatprep.mubr.bf16.mxu1 %v1313_v61 }
  0xa3   :  { %763 = vmatprep.mubr.bf16.mxu0 %v1313_v61 }
  0xa4   :  { %734 = vmatpush1.bf16.msra.mxu0 %v1077_v43 }
  0xa5   :  { %855 = vmatpush1.bf16.msra.mxu1 %v1074_v41  ;;  %735 = vmatprep.subr.bf16.mxu0 %v1085_v46 }
  0xa6   :  { %856 = vmatprep.subr.bf16.mxu1 %v1082_v44 }
  0xa8   :  { %736 = vmatpush1.bf16.msra.mxu0 %v1083_v47 }
  0xa9   :  { %857 = vmatpush1.bf16.msra.mxu1 %v1080_v45  ;;  %737 = vmatprep.subr.bf16.mxu0 %v1091_v50  ;;  %v538_v50 = vld [vmem:[#allocation5 + $0x8] sm:$0xf] }
  0xaa   :  { %858 = vmatprep.subr.bf16.mxu1 %v1088_v48 }
  0xac   :  { %738 = vmatpush1.bf16.msra.mxu0 %v1089_v51 }
  0xad   :  { %859 = vmatpush1.bf16.msra.mxu1 %v1086_v49  ;;  %739 = vmatprep.subr.bf16.mxu0 %v1097_v54  ;;  %v540_v54 = vld [vmem:[#allocation7 + $0x8] sm:$0xf] }
  0xae   :  { %860 = vmatprep.subr.bf16.mxu1 %v1094_v53 }
  0xb0   :  { %740 = vmatpush1.bf16.msra.mxu0 %v1095_v55 }
  0xb1   :  { %861 = vmatpush1.bf16.msra.mxu1 %v1092_v52  ;;  %741 = vmatprep.subr.bf16.mxu0 %v1103_v57 }
  0xb2   :  { %862 = vmatprep.subr.bf16.mxu1 %v1100_v56 }
  0xb4   :  { %742 = vmatpush1.bf16.msra.mxu0 %v1101_v60 }
  0xb5   :  { %863 = vmatpush1.bf16.msra.mxu1 %v1098_v58  ;;  %743 = vmatprep.subr.bf16.mxu0 %v1109_v62 }
  0xb6   :  { %864 = vmatprep.subr.bf16.mxu1 %v1106_v59 }
  0xb8   :  { %744 = vmatpush1.bf16.msra.mxu0 %v1107_v1 }
  0xb9   :  { %865 = vmatpush1.bf16.msra.mxu1 %v1104_v63  ;;  %745 = vmatprep.subr.bf16.mxu0 %v1115_v2 }
  0xba   :  { %866 = vmatprep.subr.bf16.mxu1 %v1112_v0 }
  0xbc   :  { %746 = vmatpush1.bf16.msra.mxu0 %v1113_v4 }
  0xbd   :  { %867 = vmatpush1.bf16.msra.mxu1 %v1110_v3 }
 0x172   :  { %v995_v7 = vpop.f32.mrb[0].mxu0 }
 0x173   :  { %v1017_v8 = vpop.f32.mrb[0].mxu1  ;;  %v996_v10 = vpop.f32.mrb[1].mxu0 }
 0x174   :  { %v1018_v11 = vpop.f32.mrb[1].mxu1  ;;  %v997_v12 = vadd.f32 %v996_v10, %v995_v7  ;;  %v998_v15 = vpop.f32.mrb[2].mxu0  ;;  %v574_v10 = vld [vmem:[#allocation5 + $0xc] sm:$0xf] }
 0x175   :  { %v1019_v14 = vadd.f32 %v1018_v11, %v1017_v8  ;;  %v1020_v16 = vpop.f32.mrb[2].mxu1  ;;  %v999_v18 = vpop.f32.mrb[3].mxu0  ;;  %v576_v15 = vld [vmem:[#allocation7 + $0xc] sm:$0xf] }
 0x176   :  { %v1021_v19 = vpop.f32.mrb[3].mxu1  ;;  %v462_v20 = vcombine.high %v997_v12, %v997_v12  ;;  %v472_v22 = vrot.slane %v997_v12, %v471_v9  ;;  %v508_v29 = vrot.slane %v997_v12, %v507_v13  ;;  %v544_v41 = vrot.slane %v997_v12, %v543_v23 }
 0x177   :  { %v465_v25 = vcombine.high %v1019_v14, %v1019_v14  ;;  %v484_v26 = vrot.slane %v1019_v14, %v471_v9  ;;  %v520_v36 = vrot.slane %v1019_v14, %v507_v13  ;;  %v580_v42 = vrot.slane %v997_v12, %v579_v24 }
 0x178   :  { %v476_v27 = vrot.slane %v462_v20, %v471_v9  ;;  %v493_v28 = vmul.f32 %v472_v22, %v468_v17  ;;  %v477_v30 = vmul.f32 %v472_v22, %v467_v21  ;;  %v512_v35 = vrot.slane %v462_v20, %v507_v13 }
 0x179   :  { %v488_v40 = vrot.slane %v465_v25, %v471_v9  ;;  %v489_v43 = vmul.f32 %v484_v26, %v468_v17  ;;  %v497_v44 = vmul.f32 %v484_v26, %v467_v21  ;;  %v513_v45 = vmul.f32 %v508_v29, %v502_v31 }
 0x17a   :  { %v478_v37 = vmul.f32 %v476_v27, %v467_v21  ;;  %v494_v38 = vmul.f32 %v476_v27, %v468_v17  ;;  %v495_v39 = vsub.f32 0.0, %v493_v28  ;;  %v529_v46 = vmul.f32 %v508_v29, %v504_v34 }
 0x17b   :  { %v490_v47 = vmul.f32 %v488_v40, %v468_v17  ;;  %v524_v48 = vrot.slane %v465_v25, %v507_v13  ;;  %v491_v51 = vsub.f32 %v477_v30, %v489_v43  ;;  %v525_v53 = vmul.f32 %v520_v36, %v504_v34 }
 0x17c   :  { %v496_v49 = vsub.f32 0.0, %v494_v38  ;;  %v499_v52 = vsub.f32 %v495_v39, %v497_v44  ;;  %v556_v55 = vrot.slane %v1019_v14, %v543_v23  ;;  %v514_v57 = vmul.f32 %v512_v35, %v502_v31 }
 0x17d   :  { %v492_v56 = vsub.f32 %v478_v37, %v490_v47  ;;  %v548_v58 = vrot.slane %v462_v20, %v543_v23  ;;  %v498_v59 = vmul.f32 %v488_v40, %v467_v21  ;;  %v515_v60 = vadd.f32 %v513_v45, %v491_v51 }
 0x17e   :  { %v531_v61 = vsub.f32 %v499_v52, %v529_v46  ;;  %v533_v62 = vmul.f32 %v520_v36, %v502_v31  ;;  %v549_v63 = vmul.f32 %v544_v41, %v538_v50  ;;  %v526_v1 = vmul.f32 %v524_v48, %v504_v34 }
 0x17f   :  { %v516_v0 = vadd.f32 %v514_v57, %v492_v56  ;;  %v560_v2 = vrot.slane %v465_v25, %v543_v23  ;;  %v565_v3 = vmul.f32 %v544_v41, %v540_v54  ;;  %v527_v4 = vsub.f32 %v515_v60, %v525_v53 }
 0x180   :  { %v535_v5 = vsub.f32 %v531_v61, %v533_v62  ;;  %v592_v6 = vrot.slane %v1019_v14, %v579_v24  ;;  %v561_v7 = vmul.f32 %v556_v55, %v540_v54  ;;  %v550_v9 = vmul.f32 %v548_v58, %v538_v50 }
 0x181   :  { %v528_v8 = vsub.f32 %v516_v0, %v526_v1  ;;  %v584_v11 = vrot.slane %v462_v20, %v579_v24  ;;  %v569_v12 = vmul.f32 %v556_v55, %v538_v50  ;;  %v551_v13 = vadd.f32 %v549_v63, %v527_v4 }
 0x182   :  { %v500_v16 = vsub.f32 %v496_v49, %v498_v59  ;;  %v530_v17 = vmul.f32 %v512_v35, %v504_v34  ;;  %v562_v19 = vmul.f32 %v560_v2, %v540_v54  ;;  %v596_v21 = vrot.slane %v465_v25, %v579_v24 }
 0x183   :  { %v552_v18 = vadd.f32 %v550_v9, %v528_v8  ;;  %v567_v22 = vsub.f32 %v535_v5, %v565_v3  ;;  %v563_v26 = vsub.f32 %v551_v13, %v561_v7  ;;  %v585_v23 = vmul.f32 %v580_v42, %v574_v10 }
 0x184   :  { %v532_v27 = vsub.f32 %v500_v16, %v530_v17  ;;  %v534_v28 = vmul.f32 %v524_v48, %v502_v31  ;;  %v586_v14 = vmul.f32 %v584_v11, %v574_v10  ;;  %v601_v36 = vmul.f32 %v580_v42, %v576_v15 }
 0x185   :  { %v564_v29 = vsub.f32 %v552_v18, %v562_v19  ;;  %v571_v30 = vsub.f32 %v567_v22, %v569_v12  ;;  %v587_v37 = vadd.f32 %v585_v23, %v563_v26  ;;  %v597_v38 = vmul.f32 %v592_v6, %v576_v15 }
 0x186   :  { %v536_v20 = vsub.f32 %v532_v27, %v534_v28  ;;  %v566_v39 = vmul.f32 %v548_v58, %v540_v54  ;;  %v598_v41 = vmul.f32 %v596_v21, %v576_v15  ;;  %v605_v34 = vmul.f32 %v592_v6, %v574_v10 }
 0x187   :  { %v588_v40 = vadd.f32 %v586_v14, %v564_v29  ;;  %v603_v43 = vsub.f32 %v571_v30, %v601_v36  ;;  %v599_v35 = vsub.f32 %v587_v37, %v597_v38  ;;  %v570_v24 = vmul.f32 %v560_v2, %v538_v50 }
 0x188   :  { %v568_v44 = vsub.f32 %v536_v20, %v566_v39  ;;  %v602_v47 = vmul.f32 %v584_v11, %v576_v15  ;;  %v606_v49 = vmul.f32 %v596_v21, %v574_v10 }
 0x189   :  { %v600_v25 = vsub.f32 %v588_v40, %v598_v41  ;;  %v607_v45 = vsub.f32 %v603_v43, %v605_v34 }
 0x18a   :  { %v572_v46 = vsub.f32 %v568_v44, %v570_v24 }
 0x18b   :  { %v611_v31 = vcombine.low %v599_v35, %v600_v25 }
 0x18c   :  { %v604_v48 = vsub.f32 %v572_v46, %v602_v47 }
 0x18d   :  { %v613_v51 = vpack.c.bf16 %v611_v31, %v611_v31 }
 0x18e   :  { %v608_v42 = vsub.f32 %v604_v48, %v606_v49 }
 0x18f   :  { %885 = vmatmul.mubr.bf16.vlgmr.msra.gmra.mrb[4].mxu1 %v613_v51 }
 0x190   :  { %v616_v52 = vcombine.low %v607_v45, %v608_v42 }
 0x192   :  { %v618_v53 = vpack.c.bf16 %v616_v52, %v616_v52 }
 0x194   :  { %764 = vmatmul.mubr.bf16.vlgmr.msra.gmra.mrb[4].mxu0 %v618_v53 }
 0x262   :  { %v886_v54 = vpop.f32.mrb[4].mxu1 }
 0x263   :  { %v888_v55 = vpop.f32.mrb[5].mxu1 }
 0x264   :  { %v890_v56 = vpop.f32.mrb[6].mxu1 }
 0x265   :  { %v891_v57 = vpop.f32.mrb[7].mxu1 }
 0x267   :  { %v765_v58 = vpop.f32.mrb[4].mxu0 }
 0x268   :  { %v887_v59 = vadd.f32 %v886_v54, %v765_v58  ;;  %v767_v50 = vpop.f32.mrb[5].mxu0 }
 0x269   :  { %v889_v60 = vadd.f32 %v888_v55, %v767_v50  ;;  %v769_v61 = vpop.f32.mrb[6].mxu0 }
 0x26a   :  { %v893_v62 = vadd.f32 %v887_v59, %v1459_v33  ;;  %v770_v63 = vpop.f32.mrb[7].mxu0 }
 0x26b   :  { %v894_v0 = vadd.f32 %v889_v60, %v1457_v32 }
 0x26c   :  { %895 = vst [vmem:[#allocation14] sm:$0xff] %v893_v62 }
 0x26d   :  { %896 = vst [vmem:[#allocation14 + $0x8] sm:$0xff] %v894_v0 }
 0x26e   :  { %1281 = shalt.err (!%p1278_p4)
}
 0x26f   :  { %s1282_s19 = scalar_lea.hbm %s1486_s7, 256 }
 0x270   :  { %p1283_p5 = scmp.ne.s32.totalorder %s1486_s7, %s1282_s19  ;;  %p1286_p6 = scmp.lt.u32.totalorder %s1282_s19, %s1486_s7 }
 0x272   :  { %p1288_p7 = pnand %p1286_p6, %p1283_p5 }
 0x274   :  { %1291 = shalt.err (!%p1288_p7)
}
 0x275   :  { %906 = dma.vmem_to_hbm [thread:$0]  %s904_s12, 256, %s1486_s7, [#allocation4]  }
 0x276   :  { %1300 = dma.done.wait [#allocation4], 256  }
 0x277   :  { %1301 = vsyncadd [#allocation4], 4294967040 }
 0x278   :  { %910 = vsyncpa [#allocation3], 1 }
 0x279   :  { %911 = vsyncpa [#allocation6], 1 }
 0x27a   :  { %912 = vsyncpa [#allocation9], 1 }
 0x27b   :  { %913 = vsyncpa [#allocation12], 1 }
 0x27c   :  { %914 = vsyncpa [#allocation4], 1 }

// kernel: tpu_custom_call.1
= control target key start
LH: loop header
LB: loop body
LE: loop exit
PB: predicated region body
PF: predicated region fallthrough
CT: control target
= control target key end

     0   :  { %12 = vsyncpa [#allocation3], 0  ;;  %s1479_s0 = inlined_call_operand.hbm [shape: f32[8,256], index: 0, kind: input, shape index: {}]   ;;  %s1480_s1 = inlined_call_operand.hbm [shape: f32[4,4,128], index: 1, kind: input, shape index: {}]   ;;  %s1481_s2 = inlined_call_operand.hbm [shape: f32[4,4,128], index: 2, kind: input, shape index: {}]   ;;  %s1482_s3 = inlined_call_operand.hbm [shape: bf16[256,128], index: 3, kind: input, shape index: {}]   ;;  %s1483_s4 = inlined_call_operand.hbm [shape: bf16[256,128], index: 4, kind: input, shape index: {}]   ;;  %s1484_s5 = inlined_call_operand.hbm [shape: bf16[128,256], index: 5, kind: input, shape index: {}]   ;;  %s1485_s6 = inlined_call_operand.hbm [shape: bf16[128,256], index: 6, kind: input, shape index: {}]   ;;  %s1486_s7 = inlined_call_operand.hbm [shape: f32[8,256], index: 7, kind: output, shape index: {}]  }
   0x1   :  { %13 = vsyncpa [#allocation6], 0 }
   0x2   :  { %14 = vsyncpa [#allocation9], 0 }
   0x3   :  { %15 = vsyncpa [#allocation12], 0 }
   0x4   :  { %16 = vsyncpa [#allocation4], 0  ;;  %s1302_s24 = smov [#allocation5]   ;;  %s1116_s28 = scalar_lea.hbm %s1480_s1, 256 }
   0x5   :  { %s32_s25 = sshll.u32 %s1302_s24, 4  ;;  %p1117_p0 = scmp.ne.s32.totalorder %s1480_s1, %s1116_s28  ;;  %s33_s25 = int_to_ptr.vmem [resolvable:$true] %s32_s25 }
   0x6   :  { %p1120_p1 = scmp.lt.u32.totalorder %s1116_s28, %s1480_s1 }
   0x8   :  { %p1122_p2 = pnand %p1120_p1, %p1117_p0 }
   0xa   :  { %1125 = shalt.err (!%p1122_p2)
}
   0xb   :  { %s1126_s10 = scalar_lea.vmem %s33_s25, 256  ;;  %p1131_p4 = scmp.lt.s32.totalorder %s33_s25, %s33_s25 }
   0xc   :  { %p1127_p3 = scmp.ne.s32.totalorder %s33_s25, %s1126_s10  ;;  %p1132_p5 = scmp.lt.s32.totalorder %s1126_s10, %s1126_s10 }
   0xe   :  { %p1133_p6 = por %p1132_p5, %p1131_p4 }
  0x10   :  { %p1134_p7 = pnand %p1133_p6, %p1127_p3 }
  0x12   :  { %1137 = shalt.err (!%p1134_p7)
}
  0x13   :  { %s1303_s11 = smov 64   ;;  %s1304_s12 = smov 4  }
  0x14   :  { %38 = dma.hbm_to_vmem [thread:$0]  %s1480_s1, 256, %s33_s25, [#allocation6], %s1303_s11, %s1303_s11, %s1304_s12  }
  0x15   :  { %s1305_s15 = smov [#allocation8]   ;;  %s1306_s17 = smov [#allocation11]  }
  0x16   :  { %s56_s16 = sshll.u32 %s1305_s15, 4  ;;  %s80_s18 = sshll.u32 %s1306_s17, 4  ;;  %s57_s16 = int_to_ptr.vmem [resolvable:$true] %s56_s16  ;;  %s81_s18 = int_to_ptr.vmem [resolvable:$true] %s80_s18 }
  0x17   :  { %s1138_s21 = scalar_lea.hbm %s1482_s3, 2048 }
  0x18   :  { %p1139_p8 = scmp.ne.s32.totalorder %s1482_s3, %s1138_s21  ;;  %p1142_p9 = scmp.lt.u32.totalorder %s1138_s21, %s1482_s3 }
  0x1a   :  { %p1144_p10 = pnand %p1142_p9, %p1139_p8 }
  0x1c   :  { %1147 = shalt.err (!%p1144_p10)
}
  0x1d   :  { %s1148_s1 = scalar_lea.vmem %s57_s16, 2048  ;;  %p1153_p12 = scmp.lt.s32.totalorder %s57_s16, %s57_s16 }
  0x1e   :  { %p1149_p11 = scmp.ne.s32.totalorder %s57_s16, %s1148_s1  ;;  %p1154_p13 = scmp.lt.s32.totalorder %s1148_s1, %s1148_s1 }
  0x20   :  { %p1155_p0 = por %p1154_p13, %p1153_p12 }
  0x22   :  { %p1156_p1 = pnand %p1155_p0, %p1149_p11 }
  0x24   :  { %1159 = shalt.err (!%p1156_p1)
}
  0x25   :  { %62 = dma.hbm_to_vmem [thread:$0]  %s1482_s3, 2048, %s57_s16, [#allocation9], %s1303_s11, %s1303_s11, %s1304_s12  }
  0x26   :  { %s1160_s30 = scalar_lea.hbm %s1484_s5, 2048 }
  0x27   :  { %p1161_p2 = scmp.ne.s32.totalorder %s1484_s5, %s1160_s30  ;;  %p1164_p3 = scmp.lt.u32.totalorder %s1160_s30, %s1484_s5 }
  0x29   :  { %p1166_p4 = pnand %p1164_p3, %p1161_p2 }
  0x2b   :  { %1169 = shalt.err (!%p1166_p4)
}
  0x2c   :  { %s1170_s14 = scalar_lea.vmem %s81_s18, 2048  ;;  %p1175_p6 = scmp.lt.s32.totalorder %s81_s18, %s81_s18 }
  0x2d   :  { %p1171_p5 = scmp.ne.s32.totalorder %s81_s18, %s1170_s14  ;;  %p1176_p7 = scmp.lt.s32.totalorder %s1170_s14, %s1170_s14 }
  0x2f   :  { %p1177_p8 = por %p1176_p7, %p1175_p6 }
  0x31   :  { %p1178_p9 = pnand %p1177_p8, %p1171_p5 }
  0x33   :  { %1181 = shalt.err (!%p1178_p9)
}
  0x34   :  { %s1307_s3 = smov 128   ;;  %s1308_s15 = smov 8  }
  0x35   :  { %86 = dma.hbm_to_vmem [thread:$0]  %s1484_s5, 2048, %s81_s18, [#allocation12], %s1307_s3, %s1307_s3, %s1308_s15  }
  0x36   :  { %s1309_s19 = smov [#allocation2]   ;;  %s1310_s21 = smov [#allocation7]  }
  0x37   :  { %s23_s20 = sshll.u32 %s1309_s19, 4  ;;  %s44_s22 = sshll.u32 %s1310_s21, 4  ;;  %s24_s20 = int_to_ptr.vmem [resolvable:$true] %s23_s20  ;;  %s45_s22 = int_to_ptr.vmem [resolvable:$true] %s44_s22 }
  0x38   :  { %s1182_s26 = scalar_lea.hbm %s1479_s0, 256 }
  0x39   :  { %p1183_p10 = scmp.ne.s32.totalorder %s1479_s0, %s1182_s26  ;;  %p1186_p11 = scmp.lt.u32.totalorder %s1182_s26, %s1479_s0 }
  0x3b   :  { %p1188_p12 = pnand %p1186_p11, %p1183_p10 }
  0x3d   :  { %1191 = shalt.err (!%p1188_p12)
}
  0x3e   :  { %s1192_s5 = scalar_lea.vmem %s24_s20, 256  ;;  %p1197_p0 = scmp.lt.s32.totalorder %s24_s20, %s24_s20 }
  0x3f   :  { %p1193_p13 = scmp.ne.s32.totalorder %s24_s20, %s1192_s5  ;;  %p1198_p1 = scmp.lt.s32.totalorder %s1192_s5, %s1192_s5 }
  0x41   :  { %p1199_p2 = por %p1198_p1, %p1197_p0 }
  0x43   :  { %p1200_p3 = pnand %p1199_p2, %p1193_p13 }
  0x45   :  { %1203 = shalt.err (!%p1200_p3)
}
  0x46   :  { %26 = dma.hbm_to_vmem [thread:$0]  %s1479_s0, 256, %s24_s20, [#allocation3]  }
  0x47   :  { %s1204_s9 = scalar_lea.hbm %s1481_s2, 256 }
  0x48   :  { %p1205_p4 = scmp.ne.s32.totalorder %s1481_s2, %s1204_s9  ;;  %p1208_p5 = scmp.lt.u32.totalorder %s1204_s9, %s1481_s2 }
  0x4a   :  { %p1210_p6 = pnand %p1208_p5, %p1205_p4 }
  0x4c   :  { %1213 = shalt.err (!%p1210_p6)
}
  0x4d   :  { %s1214_s17 = scalar_lea.vmem %s45_s22, 256  ;;  %p1219_p8 = scmp.lt.s32.totalorder %s45_s22, %s45_s22 }
  0x4e   :  { %p1215_p7 = scmp.ne.s32.totalorder %s45_s22, %s1214_s17  ;;  %p1220_p9 = scmp.lt.s32.totalorder %s1214_s17, %s1214_s17 }
  0x50   :  { %p1221_p10 = por %p1220_p9, %p1219_p8 }
  0x52   :  { %p1222_p11 = pnand %p1221_p10, %p1215_p7 }
  0x54   :  { %1225 = shalt.err (!%p1222_p11)
}
  0x55   :  { %50 = dma.hbm_to_vmem [thread:$0]  %s1481_s2, 256, %s45_s22, [#allocation6], %s1303_s11, %s1303_s11, %s1304_s12  }
  0x56   :  { %s1311_s20 = smov [#allocation10]   ;;  %s1312_s23 = smov [#allocation13]  }
  0x57   :  { %s68_s21 = sshll.u32 %s1311_s20, 4  ;;  %s92_s24 = sshll.u32 %s1312_s23, 4  ;;  %s69_s21 = int_to_ptr.vmem [resolvable:$true] %s68_s21  ;;  %s93_s24 = int_to_ptr.vmem [resolvable:$true] %s92_s24 }
  0x58   :  { %s1226_s25 = scalar_lea.hbm %s1483_s4, 2048 }
  0x59   :  { %p1227_p12 = scmp.ne.s32.totalorder %s1483_s4, %s1226_s25  ;;  %p1230_p13 = scmp.lt.u32.totalorder %s1226_s25, %s1483_s4 }
  0x5b   :  { %p1232_p0 = pnand %p1230_p13, %p1227_p12 }
  0x5d   :  { %1235 = shalt.err (!%p1232_p0)
}
  0x5e   :  { %s1236_s2 = scalar_lea.vmem %s69_s21, 2048  ;;  %p1241_p2 = scmp.lt.s32.totalorder %s69_s21, %s69_s21 }
  0x5f   :  { %p1237_p1 = scmp.ne.s32.totalorder %s69_s21, %s1236_s2  ;;  %p1242_p3 = scmp.lt.s32.totalorder %s1236_s2, %s1236_s2 }
  0x61   :  { %p1243_p4 = por %p1242_p3, %p1241_p2 }
  0x63   :  { %p1244_p5 = pnand %p1243_p4, %p1237_p1 }
  0x65   :  { %1247 = shalt.err (!%p1244_p5)
}
  0x66   :  { %74 = dma.hbm_to_vmem [thread:$0]  %s1483_s4, 2048, %s69_s21, [#allocation9], %s1303_s11, %s1303_s11, %s1304_s12  }
  0x67   :  { %s1248_s9 = scalar_lea.hbm %s1485_s6, 2048 }
  0x68   :  { %p1249_p6 = scmp.ne.s32.totalorder %s1485_s6, %s1248_s9  ;;  %p1252_p7 = scmp.lt.u32.totalorder %s1248_s9, %s1485_s6 }
  0x6a   :  { %p1254_p8 = pnand %p1252_p7, %p1249_p6 }
  0x6c   :  { %1257 = shalt.err (!%p1254_p8)
}
  0x6d   :  { %s1258_s17 = scalar_lea.vmem %s93_s24, 2048  ;;  %p1263_p10 = scmp.lt.s32.totalorder %s93_s24, %s93_s24 }
  0x6e   :  { %p1259_p9 = scmp.ne.s32.totalorder %s93_s24, %s1258_s17  ;;  %p1264_p11 = scmp.lt.s32.totalorder %s1258_s17, %s1258_s17 }
  0x70   :  { %p1265_p12 = por %p1264_p11, %p1263_p10 }
  0x72   :  { %p1266_p13 = pnand %p1265_p12, %p1259_p9 }
  0x74   :  { %1269 = shalt.err (!%p1266_p13)
}
  0x75   :  { %98 = dma.hbm_to_vmem [thread:$0]  %s1485_s6, 2048, %s93_s24, [#allocation12], %s1307_s3, %s1307_s3, %s1308_s15  }
  0x76   :  { %1292 = dma.done.wait [#allocation3], 256  }
  0x77   :  { %1293 = vsyncadd [#allocation3], 4294967040 }
  0x78   :  { %1294 = dma.done.wait [#allocation6], 512  }
  0x79   :  { %1295 = vsyncadd [#allocation6], 4294966784 }
  0x7a   :  { %1296 = dma.done.wait [#allocation9], 4096  }
  0x7b   :  { %1297 = vsyncadd [#allocation9], 4294963200 }
  0x7c   :  { %1298 = dma.done.wait [#allocation12], 4096  }
  0x7d   :  { %1299 = vsyncadd [#allocation12], 4294963200  ;;  %v1036_v0 = vld [vmem:[#allocation8 + $0x40] sm:$0xff]   ;;  %v1040_v4 = vld [vmem:[#allocation8 + $0x48] sm:$0xff]   ;;  %v1313_v61 = vmov 0   ;;  %s1314_s6 = smov [#allocation14]  }
  0x7e   :  { %v1037_v1 = vld [vmem:[#allocation10 + $0x40] sm:$0xff]   ;;  %979 = vmatprep.subr.bf16.mxu0 %v1036_v0  ;;  %v1041_v5 = vld [vmem:[#allocation10 + $0x48] sm:$0xff]   ;;  %v1044_v8 = vld [vmem:[#allocation8 + $0x50] sm:$0xff]   ;;  %s903_s12 = sshll.u32 %s1314_s6, 4  ;;  %s904_s12 = int_to_ptr.vmem [resolvable:$true] %s903_s12 }
  0x7f   :  { %v1038_v2 = vld [vmem:[#allocation8] sm:$0xff]   ;;  %1001 = vmatprep.subr.bf16.mxu1 %v1037_v1  ;;  %v1042_v6 = vld [vmem:[#allocation8 + $0x8] sm:$0xff]   ;;  %v1045_v9 = vld [vmem:[#allocation10 + $0x50] sm:$0xff]   ;;  %s1270_s3 = scalar_lea.vmem %s904_s12, 256  ;;  %p1275_p1 = scmp.lt.s32.totalorder %s904_s12, %s904_s12 }
  0x80   :  { %v1039_v3 = vld [vmem:[#allocation10] sm:$0xff]   ;;  %980 = vmatpush3.bf16.msra.mxu0 %v1038_v2  ;;  %v1043_v7 = vld [vmem:[#allocation10 + $0x8] sm:$0xff]   ;;  %v1046_v10 = vld [vmem:[#allocation8 + $0x10] sm:$0xff]   ;;  %p1271_p0 = scmp.ne.s32.totalorder %s904_s12, %s1270_s3  ;;  %p1276_p2 = scmp.lt.s32.totalorder %s1270_s3, %s1270_s3 }
  0x81   :  { %1002 = vmatpush3.bf16.msra.mxu1 %v1039_v3  ;;  %981 = vmatprep.subr.bf16.mxu0 %v1040_v4  ;;  %v1047_v11 = vld [vmem:[#allocation10 + $0x10] sm:$0xff]   ;;  %v1048_v12 = vld [vmem:[#allocation8 + $0x58] sm:$0xff]   ;;  %v1052_v16 = vld [vmem:[#allocation8 + $0x60] sm:$0xff]  }
  0x82   :  { %1003 = vmatprep.subr.bf16.mxu1 %v1041_v5  ;;  %v1049_v13 = vld [vmem:[#allocation10 + $0x58] sm:$0xff]   ;;  %v1053_v17 = vld [vmem:[#allocation10 + $0x60] sm:$0xff]   ;;  %v1056_v20 = vld [vmem:[#allocation8 + $0x68] sm:$0xff]   ;;  %v469_v5 = vlaneseq  ;;  %p1277_p3 = por %p1276_p2, %p1275_p1 }
  0x83   :  { %v1050_v14 = vld [vmem:[#allocation8 + $0x18] sm:$0xff]   ;;  %v1054_v18 = vld [vmem:[#allocation8 + $0x20] sm:$0xff]   ;;  %v1057_v21 = vld [vmem:[#allocation10 + $0x68] sm:$0xff]  }
  0x84   :  { %982 = vmatpush3.bf16.msra.mxu0 %v1042_v6  ;;  %v1051_v15 = vld [vmem:[#allocation10 + $0x18] sm:$0xff]   ;;  %v1055_v19 = vld [vmem:[#allocation10 + $0x20] sm:$0xff]   ;;  %v1058_v22 = vld [vmem:[#allocation8 + $0x28] sm:$0xff]   ;;  %v470_v6 = vshrl.u32 %v469_v5, 7  ;;  %p1278_p4 = pnand %p1277_p3, %p1271_p0 }
  0x85   :  { %1004 = vmatpush3.bf16.msra.mxu1 %v1043_v7  ;;  %983 = vmatprep.subr.bf16.mxu0 %v1044_v8  ;;  %v1059_v23 = vld [vmem:[#allocation10 + $0x28] sm:$0xff]   ;;  %v1060_v24 = vld [vmem:[#allocation8 + $0x70] sm:$0xff]   ;;  %v1064_v28 = vld [vmem:[#allocation8 + $0x78] sm:$0xff]  }
  0x86   :  { %1005 = vmatprep.subr.bf16.mxu1 %v1045_v9  ;;  %v1061_v25 = vld [vmem:[#allocation10 + $0x70] sm:$0xff]   ;;  %v1065_v29 = vld [vmem:[#allocation10 + $0x78] sm:$0xff]   ;;  %v1068_v36 = vld [vmem:[#allocation11] ss:$8 sps:$4 sm:$0xff]   ;;  %v471_v9 = vsub.s32 0, %v470_v6 }
  0x87   :  { %v1062_v26 = vld [vmem:[#allocation8 + $0x30] sm:$0xff]   ;;  %v1066_v30 = vld [vmem:[#allocation8 + $0x38] sm:$0xff]   ;;  %v1070_v37 = vld [vmem:[#allocation11 + $0x4] ss:$8 sps:$4 sm:$0xff]  }
  0x88   :  { %984 = vmatpush3.bf16.msra.mxu0 %v1046_v10  ;;  %v1063_v27 = vld [vmem:[#allocation10 + $0x30] sm:$0xff]   ;;  %v1067_v31 = vld [vmem:[#allocation10 + $0x38] sm:$0xff]   ;;  %v1071_v38 = vld [vmem:[#allocation13] ss:$8 sps:$4 sm:$0xff]  }
  0x89   :  { %1006 = vmatpush3.bf16.msra.mxu1 %v1047_v11  ;;  %985 = vmatprep.subr.bf16.mxu0 %v1048_v12  ;;  %v1457_v32 = vld [vmem:[#allocation2 + $0x8] sm:$0xff]  ;;  %v1459_v33 = vld [vmem:[#allocation2] sm:$0xff]  ;;  %v1073_v39 = vld [vmem:[#allocation13 + $0x4] ss:$8 sps:$4 sm:$0xff]  }
  0x8a   :  { %1007 = vmatprep.subr.bf16.mxu1 %v1049_v13  ;;  %v124_v34 = vpack.c.bf16 %v1457_v32, %v1457_v32  ;;  %v123_v35 = vpack.c.bf16 %v1459_v33, %v1459_v33  ;;  %v1076_v40 = vld [vmem:[#allocation11 + $0x14] ss:$8 sps:$4 sm:$0xff]   ;;  %v1074_v41 = vld [vmem:[#allocation11 + $0x10] ss:$8 sps:$4 sm:$0xff]   ;;  %v1082_v44 = vld [vmem:[#allocation11 + $0x24] ss:$8 sps:$4 sm:$0xff]  }
  0x8b   :  { %v1079_v42 = vld [vmem:[#allocation13 + $0x14] ss:$8 sps:$4 sm:$0xff]   ;;  %v1077_v43 = vld [vmem:[#allocation13 + $0x10] ss:$8 sps:$4 sm:$0xff]   ;;  %v1080_v45 = vld [vmem:[#allocation11 + $0x20] ss:$8 sps:$4 sm:$0xff]  }
  0x8c   :  { %986 = vmatpush3.bf16.msra.mxu0 %v1050_v14  ;;  %285 = vmatprep.mubr.bf16.mxu0 %v124_v34  ;;  %v1085_v46 = vld [vmem:[#allocation13 + $0x24] ss:$8 sps:$4 sm:$0xff]   ;;  %v1083_v47 = vld [vmem:[#allocation13 + $0x20] ss:$8 sps:$4 sm:$0xff]   ;;  %v1088_v48 = vld [vmem:[#allocation11 + $0x34] ss:$8 sps:$4 sm:$0xff]  }
  0x8d   :  { %1008 = vmatpush3.bf16.msra.mxu1 %v1051_v15  ;;  %987 = vmatprep.subr.bf16.mxu0 %v1052_v16  ;;  %v1086_v49 = vld [vmem:[#allocation11 + $0x30] ss:$8 sps:$4 sm:$0xff]   ;;  %v1091_v50 = vld [vmem:[#allocation13 + $0x34] ss:$8 sps:$4 sm:$0xff]   ;;  %v1092_v52 = vld [vmem:[#allocation11 + $0x40] ss:$8 sps:$4 sm:$0xff]  }
  0x8e   :  { %1009 = vmatprep.subr.bf16.mxu1 %v1053_v17  ;;  %453 = vmatprep.mubr.bf16.mxu1 %v124_v34  ;;  %v1089_v51 = vld [vmem:[#allocation13 + $0x30] ss:$8 sps:$4 sm:$0xff]   ;;  %v1094_v53 = vld [vmem:[#allocation11 + $0x44] ss:$8 sps:$4 sm:$0xff]   ;;  %v1095_v55 = vld [vmem:[#allocation13 + $0x40] ss:$8 sps:$4 sm:$0xff]  }
  0x8f   :  { %v1097_v54 = vld [vmem:[#allocation13 + $0x44] ss:$8 sps:$4 sm:$0xff]   ;;  %v1100_v56 = vld [vmem:[#allocation11 + $0x54] ss:$8 sps:$4 sm:$0xff]   ;;  %v1098_v58 = vld [vmem:[#allocation11 + $0x50] ss:$8 sps:$4 sm:$0xff]  }
  0x90   :  { %988 = vmatpush3.bf16.msra.mxu0 %v1054_v18  ;;  %v1103_v57 = vld [vmem:[#allocation13 + $0x54] ss:$8 sps:$4 sm:$0xff]   ;;  %v1106_v59 = vld [vmem:[#allocation11 + $0x64] ss:$8 sps:$4 sm:$0xff]   ;;  %v1101_v60 = vld [vmem:[#allocation13 + $0x50] ss:$8 sps:$4 sm:$0xff]  }
  0x91   :  { %1010 = vmatpush3.bf16.msra.mxu1 %v1055_v19  ;;  %989 = vmatprep.subr.bf16.mxu0 %v1056_v20  ;;  %v1109_v62 = vld [vmem:[#allocation13 + $0x64] ss:$8 sps:$4 sm:$0xff]   ;;  %v1104_v63 = vld [vmem:[#allocation11 + $0x60] ss:$8 sps:$4 sm:$0xff]   ;;  %v1112_v0 = vld [vmem:[#allocation11 + $0x74] ss:$8 sps:$4 sm:$0xff]  }
  0x92   :  { %1011 = vmatprep.subr.bf16.mxu1 %v1057_v21  ;;  %v1107_v1 = vld [vmem:[#allocation13 + $0x60] ss:$8 sps:$4 sm:$0xff]   ;;  %v1115_v2 = vld [vmem:[#allocation13 + $0x74] ss:$8 sps:$4 sm:$0xff]   ;;  %v1110_v3 = vld [vmem:[#allocation11 + $0x70] ss:$8 sps:$4 sm:$0xff]  }
  0x93   :  { %v1113_v4 = vld [vmem:[#allocation13 + $0x70] ss:$8 sps:$4 sm:$0xff]   ;;  %v507_v13 = vsub.s32 1, %v470_v6  ;;  %v467_v21 = vld [vmem:[#allocation5] sm:$0xf] }
  0x94   :  { %990 = vmatpush3.bf16.msra.mxu0 %v1058_v22  ;;  %v468_v17 = vld [vmem:[#allocation7] sm:$0xf]  ;;  %v504_v34 = vld [vmem:[#allocation7 + $0x4] sm:$0xf] }
  0x95   :  { %1012 = vmatpush3.bf16.msra.mxu1 %v1059_v23  ;;  %991 = vmatprep.subr.bf16.mxu0 %v1060_v24  ;;  %v543_v23 = vsub.s32 2, %v470_v6  ;;  %v579_v24 = vsub.s32 3, %v470_v6 }
  0x96   :  { %1013 = vmatprep.subr.bf16.mxu1 %v1061_v25 }
  0x98   :  { %992 = vmatpush3.bf16.msra.mxu0 %v1062_v26 }
  0x99   :  { %1014 = vmatpush3.bf16.msra.mxu1 %v1063_v27  ;;  %993 = vmatprep.subr.bf16.mxu0 %v1064_v28 }
  0x9a   :  { %1015 = vmatprep.subr.bf16.mxu1 %v1065_v29 }
  0x9c   :  { %994 = vmatpush3.bf16.msra.mxu0 %v1066_v30 }
  0x9d   :  { %1016 = vmatpush3.bf16.msra.mxu1 %v1067_v31  ;;  %731 = vmatprep.subr.bf16.mxu0 %v1073_v39  ;;  %v502_v31 = vld [vmem:[#allocation5 + $0x4] sm:$0xf] }
  0x9e   :  { %852 = vmatprep.subr.bf16.mxu1 %v1070_v37 }
  0x9f   :  { %286 = vmatmul.mubr.bf16.vlgmr.msra.gmra.mrb[0].mxu0 %v123_v35 }
  0xa0   :  { %454 = vmatmul.mubr.bf16.vlgmr.msra.gmra.mrb[0].mxu1 %v123_v35  ;;  %732 = vmatpush1.bf16.msra.mxu0 %v1071_v38 }
  0xa1   :  { %853 = vmatpush1.bf16.msra.mxu1 %v1068_v36  ;;  %733 = vmatprep.subr.bf16.mxu0 %v1079_v42 }
  0xa2   :  { %854 = vmatprep.subr.bf16.mxu1 %v1076_v40  ;;  %884 = vmatprep.mubr.bf16.mxu1 %v1313_v61 }
  0xa3   :  { %763 = vmatprep.mubr.bf16.mxu0 %v1313_v61 }
  0xa4   :  { %734 = vmatpush1.bf16.msra.mxu0 %v1077_v43 }
  0xa5   :  { %855 = vmatpush1.bf16.msra.mxu1 %v1074_v41  ;;  %735 = vmatprep.subr.bf16.mxu0 %v1085_v46 }
  0xa6   :  { %856 = vmatprep.subr.bf16.mxu1 %v1082_v44 }
  0xa8   :  { %736 = vmatpush1.bf16.msra.mxu0 %v1083_v47 }
  0xa9   :  { %857 = vmatpush1.bf16.msra.mxu1 %v1080_v45  ;;  %737 = vmatprep.subr.bf16.mxu0 %v1091_v50  ;;  %v538_v50 = vld [vmem:[#allocation5 + $0x8] sm:$0xf] }
  0xaa   :  { %858 = vmatprep.subr.bf16.mxu1 %v1088_v48 }
  0xac   :  { %738 = vmatpush1.bf16.msra.mxu0 %v1089_v51 }
  0xad   :  { %859 = vmatpush1.bf16.msra.mxu1 %v1086_v49  ;;  %739 = vmatprep.subr.bf16.mxu0 %v1097_v54  ;;  %v540_v54 = vld [vmem:[#allocation7 + $0x8] sm:$0xf] }
  0xae   :  { %860 = vmatprep.subr.bf16.mxu1 %v1094_v53 }
  0xb0   :  { %740 = vmatpush1.bf16.msra.mxu0 %v1095_v55 }
  0xb1   :  { %861 = vmatpush1.bf16.msra.mxu1 %v1092_v52  ;;  %741 = vmatprep.subr.bf16.mxu0 %v1103_v57 }
  0xb2   :  { %862 = vmatprep.subr.bf16.mxu1 %v1100_v56 }
  0xb4   :  { %742 = vmatpush1.bf16.msra.mxu0 %v1101_v60 }
  0xb5   :  { %863 = vmatpush1.bf16.msra.mxu1 %v1098_v58  ;;  %743 = vmatprep.subr.bf16.mxu0 %v1109_v62 }
  0xb6   :  { %864 = vmatprep.subr.bf16.mxu1 %v1106_v59 }
  0xb8   :  { %744 = vmatpush1.bf16.msra.mxu0 %v1107_v1 }
  0xb9   :  { %865 = vmatpush1.bf16.msra.mxu1 %v1104_v63  ;;  %745 = vmatprep.subr.bf16.mxu0 %v1115_v2 }
  0xba   :  { %866 = vmatprep.subr.bf16.mxu1 %v1112_v0 }
  0xbc   :  { %746 = vmatpush1.bf16.msra.mxu0 %v1113_v4 }
  0xbd   :  { %867 = vmatpush1.bf16.msra.mxu1 %v1110_v3 }
 0x172   :  { %v995_v7 = vpop.f32.mrb[0].mxu0 }
 0x173   :  { %v1017_v8 = vpop.f32.mrb[0].mxu1  ;;  %v996_v10 = vpop.f32.mrb[1].mxu0 }
 0x174   :  { %v1018_v11 = vpop.f32.mrb[1].mxu1  ;;  %v997_v12 = vadd.f32 %v996_v10, %v995_v7  ;;  %v998_v15 = vpop.f32.mrb[2].mxu0  ;;  %v574_v10 = vld [vmem:[#allocation5 + $0xc] sm:$0xf] }
 0x175   :  { %v1019_v14 = vadd.f32 %v1018_v11, %v1017_v8  ;;  %v1020_v16 = vpop.f32.mrb[2].mxu1  ;;  %v999_v18 = vpop.f32.mrb[3].mxu0  ;;  %v576_v15 = vld [vmem:[#allocation7 + $0xc] sm:$0xf] }
 0x176   :  { %v1021_v19 = vpop.f32.mrb[3].mxu1  ;;  %v462_v20 = vcombine.high %v997_v12, %v997_v12  ;;  %v472_v22 = vrot.slane %v997_v12, %v471_v9  ;;  %v508_v29 = vrot.slane %v997_v12, %v507_v13  ;;  %v544_v41 = vrot.slane %v997_v12, %v543_v23 }
 0x177   :  { %v465_v25 = vcombine.high %v1019_v14, %v1019_v14  ;;  %v484_v26 = vrot.slane %v1019_v14, %v471_v9  ;;  %v520_v36 = vrot.slane %v1019_v14, %v507_v13  ;;  %v580_v42 = vrot.slane %v997_v12, %v579_v24 }
 0x178   :  { %v476_v27 = vrot.slane %v462_v20, %v471_v9  ;;  %v493_v28 = vmul.f32 %v472_v22, %v468_v17  ;;  %v477_v30 = vmul.f32 %v472_v22, %v467_v21  ;;  %v512_v35 = vrot.slane %v462_v20, %v507_v13 }
 0x179   :  { %v488_v40 = vrot.slane %v465_v25, %v471_v9  ;;  %v489_v43 = vmul.f32 %v484_v26, %v468_v17  ;;  %v497_v44 = vmul.f32 %v484_v26, %v467_v21  ;;  %v513_v45 = vmul.f32 %v508_v29, %v502_v31 }
 0x17a   :  { %v478_v37 = vmul.f32 %v476_v27, %v467_v21  ;;  %v494_v38 = vmul.f32 %v476_v27, %v468_v17  ;;  %v495_v39 = vsub.f32 0.0, %v493_v28  ;;  %v529_v46 = vmul.f32 %v508_v29, %v504_v34 }
 0x17b   :  { %v490_v47 = vmul.f32 %v488_v40, %v468_v17  ;;  %v524_v48 = vrot.slane %v465_v25, %v507_v13  ;;  %v491_v51 = vsub.f32 %v477_v30, %v489_v43  ;;  %v525_v53 = vmul.f32 %v520_v36, %v504_v34 }
 0x17c   :  { %v496_v49 = vsub.f32 0.0, %v494_v38  ;;  %v499_v52 = vsub.f32 %v495_v39, %v497_v44  ;;  %v556_v55 = vrot.slane %v1019_v14, %v543_v23  ;;  %v514_v57 = vmul.f32 %v512_v35, %v502_v31 }
 0x17d   :  { %v492_v56 = vsub.f32 %v478_v37, %v490_v47  ;;  %v548_v58 = vrot.slane %v462_v20, %v543_v23  ;;  %v498_v59 = vmul.f32 %v488_v40, %v467_v21  ;;  %v515_v60 = vadd.f32 %v513_v45, %v491_v51 }
 0x17e   :  { %v531_v61 = vsub.f32 %v499_v52, %v529_v46  ;;  %v533_v62 = vmul.f32 %v520_v36, %v502_v31  ;;  %v549_v63 = vmul.f32 %v544_v41, %v538_v50  ;;  %v526_v1 = vmul.f32 %v524_v48, %v504_v34 }
 0x17f   :  { %v516_v0 = vadd.f32 %v514_v57, %v492_v56  ;;  %v560_v2 = vrot.slane %v465_v25, %v543_v23  ;;  %v565_v3 = vmul.f32 %v544_v41, %v540_v54  ;;  %v527_v4 = vsub.f32 %v515_v60, %v525_v53 }
 0x180   :  { %v535_v5 = vsub.f32 %v531_v61, %v533_v62  ;;  %v592_v6 = vrot.slane %v1019_v14, %v579_v24  ;;  %v561_v7 = vmul.f32 %v556_v55, %v540_v54  ;;  %v550_v9 = vmul.f32 %v548_v58, %v538_v50 }
 0x181   :  { %v528_v8 = vsub.f32 %v516_v0, %v526_v1  ;;  %v584_v11 = vrot.slane %v462_v20, %v579_v24  ;;  %v569_v12 = vmul.f32 %v556_v55, %v538_v50  ;;  %v551_v13 = vadd.f32 %v549_v63, %v527_v4 }
 0x182   :  { %v500_v16 = vsub.f32 %v496_v49, %v498_v59  ;;  %v530_v17 = vmul.f32 %v512_v35, %v504_v34  ;;  %v562_v19 = vmul.f32 %v560_v2, %v540_v54  ;;  %v596_v21 = vrot.slane %v465_v25, %v579_v24 }
 0x183   :  { %v552_v18 = vadd.f32 %v550_v9, %v528_v8  ;;  %v567_v22 = vsub.f32 %v535_v5, %v565_v3  ;;  %v563_v26 = vsub.f32 %v551_v13, %v561_v7  ;;  %v585_v23 = vmul.f32 %v580_v42, %v574_v10 }
 0x184   :  { %v532_v27 = vsub.f32 %v500_v16, %v530_v17  ;;  %v534_v28 = vmul.f32 %v524_v48, %v502_v31  ;;  %v586_v14 = vmul.f32 %v584_v11, %v574_v10  ;;  %v601_v36 = vmul.f32 %v580_v42, %v576_v15 }
 0x185   :  { %v564_v29 = vsub.f32 %v552_v18, %v562_v19  ;;  %v571_v30 = vsub.f32 %v567_v22, %v569_v12  ;;  %v587_v37 = vadd.f32 %v585_v23, %v563_v26  ;;  %v597_v38 = vmul.f32 %v592_v6, %v576_v15 }
 0x186   :  { %v536_v20 = vsub.f32 %v532_v27, %v534_v28  ;;  %v566_v39 = vmul.f32 %v548_v58, %v540_v54  ;;  %v598_v41 = vmul.f32 %v596_v21, %v576_v15  ;;  %v605_v34 = vmul.f32 %v592_v6, %v574_v10 }
 0x187   :  { %v588_v40 = vadd.f32 %v586_v14, %v564_v29  ;;  %v603_v43 = vsub.f32 %v571_v30, %v601_v36  ;;  %v599_v35 = vsub.f32 %v587_v37, %v597_v38  ;;  %v570_v24 = vmul.f32 %v560_v2, %v538_v50 }
 0x188   :  { %v568_v44 = vsub.f32 %v536_v20, %v566_v39  ;;  %v602_v47 = vmul.f32 %v584_v11, %v576_v15  ;;  %v606_v49 = vmul.f32 %v596_v21, %v574_v10 }
 0x189   :  { %v600_v25 = vsub.f32 %v588_v40, %v598_v41  ;;  %v607_v45 = vsub.f32 %v603_v43, %v605_v34 }
 0x18a   :  { %v572_v46 = vsub.f32 %v568_v44, %v570_v24 }
 0x18b   :  { %v611_v31 = vcombine.low %v599_v35, %v600_v25 }
 0x18c   :  { %v604_v48 = vsub.f32 %v572_v46, %v602_v47 }
 0x18d   :  { %v613_v51 = vpack.c.bf16 %v611_v31, %v611_v31 }
 0x18e   :  { %v608_v42 = vsub.f32 %v604_v48, %v606_v49 }
 0x18f   :  { %885 = vmatmul.mubr.bf16.vlgmr.msra.gmra.mrb[4].mxu1 %v613_v51 }
 0x190   :  { %v616_v52 = vcombine.low %v607_v45, %v608_v42 }
 0x192   :  { %v618_v53 = vpack.c.bf16 %v616_v52, %v616_v52 }
 0x194   :  { %764 = vmatmul.mubr.bf16.vlgmr.msra.gmra.mrb[4].mxu0 %v618_v53 }
 0x262   :  { %v886_v54 = vpop.f32.mrb[4].mxu1 }
 0x263   :  { %v888_v55 = vpop.f32.mrb[5].mxu1 }
 0x264   :  { %v890_v56 = vpop.f32.mrb[6].mxu1 }
 0x265   :  { %v891_v57 = vpop.f32.mrb[7].mxu1 }
 0x267   :  { %v765_v58 = vpop.f32.mrb[4].mxu0 }
 0x268   :  { %v887_v59 = vadd.f32 %v886_v54, %v765_v58  ;;  %v767_v50 = vpop.f32.mrb[5].mxu0 }
 0x269   :  { %v889_v60 = vadd.f32 %v888_v55, %v767_v50  ;;  %v769_v61 = vpop.f32.mrb[6].mxu0 }
 0x26a   :  { %v893_v62 = vadd.f32 %v887_v59, %v1459_v33  ;;  %v770_v63 = vpop.f32.mrb[7].mxu0 }
 0x26b   :  { %v894_v0 = vadd.f32 %v889_v60, %v1457_v32 }
 0x26c   :  { %895 = vst [vmem:[#allocation14] sm:$0xff] %v893_v62 }
 0x26d   :  { %896 = vst [vmem:[#allocation14 + $0x8] sm:$0xff] %v894_v0 }
 0x26e   :  { %1281 = shalt.err (!%p1278_p4)
}
 0x26f   :  { %s1282_s19 = scalar_lea.hbm %s1486_s7, 256 }
 0x270   :  { %p1283_p5 = scmp.ne.s32.totalorder %s1486_s7, %s1282_s19  ;;  %p1286_p6 = scmp.lt.u32.totalorder %s1282_s19, %s1486_s7 }
 0x272   :  { %p1288_p7 = pnand %p1286_p6, %p1283_p5 }
 0x274   :  { %1291 = shalt.err (!%p1288_p7)
}
 0x275   :  { %906 = dma.vmem_to_hbm [thread:$0]  %s904_s12, 256, %s1486_s7, [#allocation4]  }
 0x276   :  { %1300 = dma.done.wait [#allocation4], 256  }
 0x277   :  { %1301 = vsyncadd [#allocation4], 4294967040 }
 0x278   :  { %910 = vsyncpa [#allocation3], 1 }
 0x279   :  { %911 = vsyncpa [#allocation6], 1 }
 0x27a   :  { %912 = vsyncpa [#allocation9], 1 }
 0x27b   :  { %913 = vsyncpa [#allocation12], 1 }
 0x27c   :  { %914 = vsyncpa [#allocation4], 1 }

</bundles_post_ra>
